<compile_context>
chip_gen: v6e
topology: v6e:2x2x1
jax: 0.10.0
libtpu: 0.0.40
codegen_flags: <defaults>
</compile_context>

<pallas_src>
import functools

import jax
import jax.numpy as jnp
import numpy as np
from jax.experimental import pallas as pl
from jax.experimental.pallas import tpu as pltpu


# ----------------------------- Pallas kernel ------------------------------ #
def _make_fused_lstm_kernel(T, B, E, H, L, mxu_dtype=jnp.float32):
    """L-layer unidirectional LSTM over T steps, fully fused in one kernel."""
    n_in = 4 + 2 * (L - 1)

    def kernel(*refs):
        x_ref = refs[0]             # (B*T, E), row index = b*T + t
        wih0_ref = refs[1]          # (E, 4H)
        whh0_ref = refs[2]          # (H, 4H)
        b0_ref = refs[3]            # (1, 4H)  (b_ih + b_hh, layer 0)
        wf_refs = [refs[4 + 2 * i] for i in range(L - 1)]   # (2H, 4H) fused
        bl_refs = [refs[5 + 2 * i] for i in range(L - 1)]   # (1, 4H)
        hs_ref = refs[n_in]         # (B, T*H)   lane-dense top-layer hiddens
        st_ref = refs[n_in + 1]     # (B, 2L*H)  lane-dense [h_0..h_{L-1}, c_0..c_{L-1}]

        f32 = jnp.float32
        cast = lambda a: a.astype(mxu_dtype)

        # -------- hoisted, loop-invariant work (off the serial chain) -------
        # Layer-0 input projection for ALL timesteps in one MXU matmul; bias
        # folded in so the per-step layer-0 add is a single VPU op.
        xw0 = jnp.dot(cast(x_ref[...]), wih0_ref[...],
                      preferred_element_type=f32) + b0_ref[...]
        xw0 = xw0.reshape(B, T, 4 * H)          # row b*T+t  ->  [b, t, :]

        whh0 = whh0_ref[...]
        wf = [r[...] for r in wf_refs]
        # Hoisted bias broadcasts for the stacked layers (emitted once, not
        # once per unrolled iteration).
        bb = [jnp.broadcast_to(r[...], (B, 4 * H)) for r in bl_refs]

        h = [jnp.zeros((B, H), f32) for _ in range(L)]
        c = [jnp.zeros((B, H), f32) for _ in range(L)]

        def cell(pre, c_prev):
            # PyTorch gate order: i, f, g, o.  One sigmoid over the full
            # (B, 4H) vreg + two tanh -> 3 EUP pushes per cell.
            s = jax.nn.sigmoid(pre)
            i_g = s[:, 0 * H:1 * H]
            f_g = s[:, 1 * H:2 * H]
            o_g = s[:, 3 * H:4 * H]
            g_g = jnp.tanh(pre[:, 2 * H:3 * H])
            c_new = f_g * c_prev + i_g * g_g
            h_new = o_g * jnp.tanh(c_new)
            return h_new, c_new

        top = []
        # Static unroll of the sequential recurrence (T and L are tiny).
        for t in range(T):
            # Layer 0: hoisted input projection + one recurrent matmul.
            pre = xw0[:, t, :] + jnp.dot(cast(h[0]), whh0,
                                         preferred_element_type=f32)
            h[0], c[0] = cell(pre, c[0])
            # Stacked layers: ONE fused matmul per cell
            # (inter-layer dropout p=0.0 -> identity).
            for l in range(1, L):
                hin = jnp.concatenate([h[l - 1], h[l]], axis=-1)   # (B, 2H)
                pre = jnp.dot(cast(hin), wf[l - 1],
                              preferred_element_type=f32) + bb[l - 1]
                h[l], c[l] = cell(pre, c[l])
            top.append(h[L - 1])

        # Single unmasked, lane-dense stores (one writeback DMA each).
        hs_ref[...] = jnp.concatenate(top, axis=-1)        # (B, T*H)
        st_ref[...] = jnp.concatenate(h + c, axis=-1)      # (B, 2L*H)

        # TODO(synk): on v7x keep the recurrent weights MXU-resident via
        # pltpu.matmul_push_rhs / matmul_acc_lhs / matmul_pop (MRB accumulate).

    return kernel


# ------------------------ parameter pre-processing ------------------------- #
def prepare_lstm_params(layer_params, use_bf16_matmul=False):
    """One-time prep: transpose weights, fuse biases, fuse stacked-layer weights.

    layer_params: list of (W_ih (4H,E_in), W_hh (4H,H), b_ih (4H,), b_hh (4H,)).
    use_bf16_matmul: cast matmul weights to bf16 (recommended on v5e/v6e; keep
      False to hold tight f32 tolerances).
    """
    wdt = jnp.bfloat16 if use_bf16_matmul else jnp.float32
    wih0, whh0, bih0, bhh0 = layer_params[0]
    prepped = {
        "wih0": jnp.transpose(wih0).astype(wdt),            # (E, 4H)
        "whh0": jnp.transpose(whh0).astype(wdt),            # (H, 4H)
        "b0": (bih0 + bhh0)[None, :].astype(jnp.float32),    # (1, 4H)
        "fused": [],
    }
    for (wih, whh, bih, bhh) in layer_params[1:]:
        wf = jnp.concatenate([jnp.transpose(wih), jnp.transpose(whh)],
                             axis=0).astype(wdt)             # (2H, 4H)
        prepped["fused"].append((wf, (bih + bhh)[None, :].astype(jnp.float32)))
    return prepped


# ------------------------ SimpleLSTM forward wrapper ----------------------- #
def simple_lstm_forward(xs, prepped, dropout_p=0.0):
    """SimpleLSTM.forward equivalent (batch_first=True, unidirectional).

    xs: (B, T, E).  Returns (hs (B,T,H), (hy (L,B,H), cy (L,B,H))).
    """
    if dropout_p != 0.0:
        # TODO(synk): for dropout_p > 0 draw a mask with pltpu.prng_* in-kernel.
        raise NotImplementedError("only dropout_p == 0.0 is implemented")

    B, T, E = xs.shape
    H = prepped["whh0"].shape[0]
    L = 1 + len(prepped["fused"])

    # Free row-major reshape: no transpose dispatch, no HBM copy.
    x2d = xs.reshape(B * T, E)

    flat_inputs = [x2d, prepped["wih0"], prepped["whh0"], prepped["b0"]]
    in_specs = [
        pl.BlockSpec((B * T, E), lambda i: (0, 0)),
        pl.BlockSpec((E, 4 * H), lambda i: (0, 0)),
        pl.BlockSpec((H, 4 * H), lambda i: (0, 0)),
        pl.BlockSpec((1, 4 * H), lambda i: (0, 0)),
    ]
    for (wf, b) in prepped["fused"]:
        flat_inputs += [wf, b]
        in_specs += [
            pl.BlockSpec((2 * H, 4 * H), lambda i: (0, 0)),
            pl.BlockSpec((1, 4 * H), lambda i: (0, 0)),
        ]

    kernel = _make_fused_lstm_kernel(T, B, E, H, L,
                                     mxu_dtype=prepped["wih0"].dtype)

    hs_flat, state_flat = pl.pallas_call(
        kernel,
        grid=(1,),
        in_specs=in_specs,
        out_specs=[
            pl.BlockSpec((B, T * H), lambda i: (0, 0)),        # lane-dense hs
            pl.BlockSpec((B, 2 * L * H), lambda i: (0, 0)),    # lane-dense states
        ],
        out_shape=(
            jax.ShapeDtypeStruct((B, T * H), jnp.float32),
            jax.ShapeDtypeStruct((B, 2 * L * H), jnp.float32),
        ),
        compiler_params=pltpu.CompilerParams(
            dimension_semantics=("arbitrary",)),   # sequential recurrence
    )(*flat_inputs)

    hs = hs_flat.reshape(B, T, H)                   # free reshape
    st = state_flat.reshape(B, 2 * L, H)            # free reshape
    hy = jnp.swapaxes(st[:, :L, :], 0, 1)           # (L, B, H)
    cy = jnp.swapaxes(st[:, L:, :], 0, 1)           # (L, B, H)
    # F.dropout(hs, p=0.0) is the identity.
    return hs, (hy, cy)


# ----------------------------- pure-JAX reference -------------------------- #
def simple_lstm_ref(xs, layer_params):
    x = jnp.transpose(xs, (1, 0, 2))
    hys, cys = [], []
    inp = x
    hs = None
    for (wih, whh, bih, bhh) in layer_params:
        B = inp.shape[1]
        H = whh.shape[1]

        def step(carry, x_t, wih=wih, whh=whh, bih=bih, bhh=bhh):
            h, c = carry
            g = x_t @ wih.T + bih + h @ whh.T + bhh
            i_g, f_g, g_g, o_g = jnp.split(g, 4, axis=-1)
            i_g = jax.nn.sigmoid(i_g)
            f_g = jax.nn.sigmoid(f_g)
            g_g = jnp.tanh(g_g)
            o_g = jax.nn.sigmoid(o_g)
            c = f_g * c + i_g * g_g
            h = o_g * jnp.tanh(c)
            return (h, c), h

        (h, c), hs = jax.lax.scan(
            step,
            (jnp.zeros((B, H), jnp.float32), jnp.zeros((B, H), jnp.float32)),
            inp)
        hys.append(h)
        cys.append(c)
        inp = hs
    return jnp.transpose(hs, (1, 0, 2)), (jnp.stack(hys), jnp.stack(cys))


# ----------------------------------- main ---------------------------------- #
if __name__ == "__main__":
    B, T, E, H, L = 2, 8, 16, 32, 2   # batch, seq, embed_size, hidden_size, n_layers
    key = jax.random.PRNGKey(0)
    k_x, key = jax.random.split(key)
    xs = jax.random.normal(k_x, (B, T, E), dtype=jnp.float32)

    # Deterministic parameter init (same shapes as nn.LSTM per layer):
    #   W_ih_l: (4H, E_in), W_hh_l: (4H, H), b_ih_l: (4H,), b_hh_l: (4H,)
    scale = 1.0 / np.sqrt(H)
    layer_params = []
    for layer in range(L):
        e_in = E if layer == 0 else H
        k1, k2, k3, k4, key = jax.random.split(key, 5)
        wih = jax.random.uniform(k1, (4 * H, e_in), jnp.float32, -scale, scale)
        whh = jax.random.uniform(k2, (4 * H, H), jnp.float32, -scale, scale)
        bih = jax.random.uniform(k3, (4 * H,), jnp.float32, -scale, scale)
        bhh = jax.random.uniform(k4, (4 * H,), jnp.float32, -scale, scale)
        layer_params.append((wih, whh, bih, bhh))

    # Pre-transpose / pre-fuse once, outside the jitted call.
    # (use_bf16_matmul=True is the v5e/v6e option; keep f32 for 1e-3 numerics.)
    prepped = prepare_lstm_params(layer_params, use_bf16_matmul=False)

    fwd = jax.jit(functools.partial(simple_lstm_forward, dropout_p=0.0))
    hs, (hy, cy) = fwd(xs, prepped)
    jax.block_until_ready((hs, hy, cy))

    hs_r, (hy_r, cy_r) = simple_lstm_ref(xs, layer_params)
    np.testing.assert_allclose(np.asarray(hs), np.asarray(hs_r), rtol=1e-3, atol=1e-3)
    np.testing.assert_allclose(np.asarray(hy), np.asarray(hy_r), rtol=1e-3, atol=1e-3)
    np.testing.assert_allclose(np.asarray(cy), np.asarray(cy_r), rtol=1e-3, atol=1e-3)

    assert hs.shape == (B, T, H) and hy.shape == (L, B, H) and cy.shape == (L, B, H)
    print("KERNEL_OK")
</pallas_src>

<mosaic_0001>
module attributes {stable_mosaic.version = 11 : i64} {
  func.func @kernel(%arg0: i32, %arg1: memref<16x16xf32, #tpu.memory_space<vmem>>, %arg2: memref<16x128xf32, #tpu.memory_space<vmem>>, %arg3: memref<32x128xf32, #tpu.memory_space<vmem>>, %arg4: memref<1x128xf32, #tpu.memory_space<vmem>>, %arg5: memref<64x128xf32, #tpu.memory_space<vmem>>, %arg6: memref<1x128xf32, #tpu.memory_space<vmem>>, %arg7: memref<2x256xf32, #tpu.memory_space<vmem>>, %arg8: memref<2x128xf32, #tpu.memory_space<vmem>>) attributes {dimension_semantics = [#tpu.dimension_semantics<arbitrary>], iteration_bounds = array<i64: 1>, scalar_prefetch = 0 : i64, scratch_operands = 0 : i64, tpu.core_type = #tpu.core_type<tc>, window_params = [{pipeline_mode = #tpu.pipeline_mode<synchronous>, transform_indices = @transform_0, window_bounds = array<i64: 16, 16>}, {pipeline_mode = #tpu.pipeline_mode<synchronous>, transform_indices = @transform_1, window_bounds = array<i64: 16, 128>}, {pipeline_mode = #tpu.pipeline_mode<synchronous>, transform_indices = @transform_2, window_bounds = array<i64: 32, 128>}, {pipeline_mode = #tpu.pipeline_mode<synchronous>, transform_indices = @transform_3, window_bounds = array<i64: 1, 128>}, {pipeline_mode = #tpu.pipeline_mode<synchronous>, transform_indices = @transform_4, window_bounds = array<i64: 64, 128>}, {pipeline_mode = #tpu.pipeline_mode<synchronous>, transform_indices = @transform_5, window_bounds = array<i64: 1, 128>}, {pipeline_mode = #tpu.pipeline_mode<synchronous>, transform_indices = @transform_6, window_bounds = array<i64: 2, 256>}, {pipeline_mode = #tpu.pipeline_mode<synchronous>, transform_indices = @transform_7, window_bounds = array<i64: 2, 128>}]} {
    %c0 = arith.constant 0 : index
    %c0_0 = arith.constant 0 : index
    %0 = vector.load %arg1[%c0, %c0_0] : memref<16x16xf32, #tpu.memory_space<vmem>>, vector<16x16xf32>
    %c0_1 = arith.constant 0 : index
    %c0_2 = arith.constant 0 : index
    %1 = vector.load %arg2[%c0_1, %c0_2] : memref<16x128xf32, #tpu.memory_space<vmem>>, vector<16x128xf32>
    %cst = arith.constant dense<0.000000e+00> : vector<16x128xf32>
    %2 = tpu.matmul %0, %1, %cst {dimension_numbers = #tpu.dot_dimension_numbers<[1], [0], [0], [1], [0, 0, 1, 1], [], []>} : vector<16x16xf32>, vector<16x128xf32>, vector<16x128xf32> -> vector<16x128xf32>
    %c0_3 = arith.constant 0 : index
    %c0_4 = arith.constant 0 : index
    %3 = vector.load %arg4[%c0_3, %c0_4] : memref<1x128xf32, #tpu.memory_space<vmem>>, vector<1x128xf32>
    %4 = vector.broadcast %3 : vector<1x128xf32> to vector<16x128xf32>
    %5 = arith.addf %2, %4 : vector<16x128xf32>
    %6 = vector.shape_cast %5 : vector<16x128xf32> to vector<2x8x128xf32>
    %c0_5 = arith.constant 0 : index
    %c0_6 = arith.constant 0 : index
    %7 = vector.load %arg3[%c0_5, %c0_6] : memref<32x128xf32, #tpu.memory_space<vmem>>, vector<32x128xf32>
    %c0_7 = arith.constant 0 : index
    %c0_8 = arith.constant 0 : index
    %8 = vector.load %arg5[%c0_7, %c0_8] : memref<64x128xf32, #tpu.memory_space<vmem>>, vector<64x128xf32>
    %c0_9 = arith.constant 0 : index
    %c0_10 = arith.constant 0 : index
    %9 = vector.load %arg6[%c0_9, %c0_10] : memref<1x128xf32, #tpu.memory_space<vmem>>, vector<1x128xf32>
    %10 = vector.shape_cast %9 : vector<1x128xf32> to vector<1x128xf32>
    %11 = vector.broadcast %10 : vector<1x128xf32> to vector<2x128xf32>
    %cst_11 = arith.constant 0.000000e+00 : f32
    %12 = vector.broadcast %cst_11 : f32 to vector<2x32xf32>
    %cst_12 = arith.constant 0.000000e+00 : f32
    %13 = vector.broadcast %cst_12 : f32 to vector<2x32xf32>
    %cst_13 = arith.constant 0.000000e+00 : f32
    %14 = vector.broadcast %cst_13 : f32 to vector<2x32xf32>
    %cst_14 = arith.constant 0.000000e+00 : f32
    %15 = vector.broadcast %cst_14 : f32 to vector<2x32xf32>
    %16 = vector.extract_strided_slice %6 {offsets = [0, 0, 0], sizes = [2, 1, 128], strides = [1, 1, 1]} : vector<2x8x128xf32> to vector<2x1x128xf32>
    %17 = vector.shape_cast %16 : vector<2x1x128xf32> to vector<2x128xf32>
    %cst_15 = arith.constant dense<0.000000e+00> : vector<2x128xf32>
    %18 = tpu.matmul %12, %7, %cst_15 {dimension_numbers = #tpu.dot_dimension_numbers<[1], [0], [0], [1], [0, 0, 1, 1], [], []>} : vector<2x32xf32>, vector<32x128xf32>, vector<2x128xf32> -> vector<2x128xf32>
    %19 = arith.addf %17, %18 : vector<2x128xf32>
    %20 = arith.negf %19 : vector<2x128xf32>
    %21 = math.exp %20 : vector<2x128xf32>
    %cst_16 = arith.constant 1.000000e+00 : f32
    %22 = vector.broadcast %cst_16 : f32 to vector<2x128xf32>
    %23 = arith.addf %22, %21 : vector<2x128xf32>
    %24 = arith.divf %22, %23 : vector<2x128xf32>
    %25 = vector.extract_strided_slice %24 {offsets = [0, 0], sizes = [2, 32], strides = [1, 1]} : vector<2x128xf32> to vector<2x32xf32>
    %26 = vector.extract_strided_slice %24 {offsets = [0, 32], sizes = [2, 32], strides = [1, 1]} : vector<2x128xf32> to vector<2x32xf32>
    %27 = vector.extract_strided_slice %24 {offsets = [0, 96], sizes = [2, 32], strides = [1, 1]} : vector<2x128xf32> to vector<2x32xf32>
    %28 = vector.extract_strided_slice %19 {offsets = [0, 64], sizes = [2, 32], strides = [1, 1]} : vector<2x128xf32> to vector<2x32xf32>
    %29 = math.tanh %28 : vector<2x32xf32>
    %30 = arith.mulf %26, %14 : vector<2x32xf32>
    %31 = arith.mulf %25, %29 : vector<2x32xf32>
    %32 = arith.addf %30, %31 : vector<2x32xf32>
    %33 = math.tanh %32 : vector<2x32xf32>
    %34 = arith.mulf %27, %33 : vector<2x32xf32>
    %35 = tpu.concatenate %34, %13 in 1 : vector<2x32xf32>, vector<2x32xf32> -> vector<2x64xf32>
    %cst_17 = arith.constant dense<0.000000e+00> : vector<2x128xf32>
    %36 = tpu.matmul %35, %8, %cst_17 {dimension_numbers = #tpu.dot_dimension_numbers<[1], [0], [0], [1], [0, 0, 1, 1], [], []>} : vector<2x64xf32>, vector<64x128xf32>, vector<2x128xf32> -> vector<2x128xf32>
    %37 = arith.addf %36, %11 : vector<2x128xf32>
    %38 = arith.negf %37 : vector<2x128xf32>
    %39 = math.exp %38 : vector<2x128xf32>
    %cst_18 = arith.constant 1.000000e+00 : f32
    %40 = vector.broadcast %cst_18 : f32 to vector<2x128xf32>
    %41 = arith.addf %40, %39 : vector<2x128xf32>
    %42 = arith.divf %40, %41 : vector<2x128xf32>
    %43 = vector.extract_strided_slice %42 {offsets = [0, 0], sizes = [2, 32], strides = [1, 1]} : vector<2x128xf32> to vector<2x32xf32>
    %44 = vector.extract_strided_slice %42 {offsets = [0, 32], sizes = [2, 32], strides = [1, 1]} : vector<2x128xf32> to vector<2x32xf32>
    %45 = vector.extract_strided_slice %42 {offsets = [0, 96], sizes = [2, 32], strides = [1, 1]} : vector<2x128xf32> to vector<2x32xf32>
    %46 = vector.extract_strided_slice %37 {offsets = [0, 64], sizes = [2, 32], strides = [1, 1]} : vector<2x128xf32> to vector<2x32xf32>
    %47 = math.tanh %46 : vector<2x32xf32>
    %48 = arith.mulf %44, %15 : vector<2x32xf32>
    %49 = arith.mulf %43, %47 : vector<2x32xf32>
    %50 = arith.addf %48, %49 : vector<2x32xf32>
    %51 = math.tanh %50 : vector<2x32xf32>
    %52 = arith.mulf %45, %51 : vector<2x32xf32>
    %53 = vector.extract_strided_slice %6 {offsets = [0, 1, 0], sizes = [2, 1, 128], strides = [1, 1, 1]} : vector<2x8x128xf32> to vector<2x1x128xf32>
    %54 = vector.shape_cast %53 : vector<2x1x128xf32> to vector<2x128xf32>
    %cst_19 = arith.constant dense<0.000000e+00> : vector<2x128xf32>
    %55 = tpu.matmul %34, %7, %cst_19 {dimension_numbers = #tpu.dot_dimension_numbers<[1], [0], [0], [1], [0, 0, 1, 1], [], []>} : vector<2x32xf32>, vector<32x128xf32>, vector<2x128xf32> -> vector<2x128xf32>
    %56 = arith.addf %54, %55 : vector<2x128xf32>
    %57 = arith.negf %56 : vector<2x128xf32>
    %58 = math.exp %57 : vector<2x128xf32>
    %cst_20 = arith.constant 1.000000e+00 : f32
    %59 = vector.broadcast %cst_20 : f32 to vector<2x128xf32>
    %60 = arith.addf %59, %58 : vector<2x128xf32>
    %61 = arith.divf %59, %60 : vector<2x128xf32>
    %62 = vector.extract_strided_slice %61 {offsets = [0, 0], sizes = [2, 32], strides = [1, 1]} : vector<2x128xf32> to vector<2x32xf32>
    %63 = vector.extract_strided_slice %61 {offsets = [0, 32], sizes = [2, 32], strides = [1, 1]} : vector<2x128xf32> to vector<2x32xf32>
    %64 = vector.extract_strided_slice %61 {offsets = [0, 96], sizes = [2, 32], strides = [1, 1]} : vector<2x128xf32> to vector<2x32xf32>
    %65 = vector.extract_strided_slice %56 {offsets = [0, 64], sizes = [2, 32], strides = [1, 1]} : vector<2x128xf32> to vector<2x32xf32>
    %66 = math.tanh %65 : vector<2x32xf32>
    %67 = arith.mulf %63, %32 : vector<2x32xf32>
    %68 = arith.mulf %62, %66 : vector<2x32xf32>
    %69 = arith.addf %67, %68 : vector<2x32xf32>
    %70 = math.tanh %69 : vector<2x32xf32>
    %71 = arith.mulf %64, %70 : vector<2x32xf32>
    %72 = tpu.concatenate %71, %52 in 1 : vector<2x32xf32>, vector<2x32xf32> -> vector<2x64xf32>
    %cst_21 = arith.constant dense<0.000000e+00> : vector<2x128xf32>
    %73 = tpu.matmul %72, %8, %cst_21 {dimension_numbers = #tpu.dot_dimension_numbers<[1], [0], [0], [1], [0, 0, 1, 1], [], []>} : vector<2x64xf32>, vector<64x128xf32>, vector<2x128xf32> -> vector<2x128xf32>
    %74 = arith.addf %73, %11 : vector<2x128xf32>
    %75 = arith.negf %74 : vector<2x128xf32>
    %76 = math.exp %75 : vector<2x128xf32>
    %cst_22 = arith.constant 1.000000e+00 : f32
    %77 = vector.broadcast %cst_22 : f32 to vector<2x128xf32>
    %78 = arith.addf %77, %76 : vector<2x128xf32>
    %79 = arith.divf %77, %78 : vector<2x128xf32>
    %80 = vector.extract_strided_slice %79 {offsets = [0, 0], sizes = [2, 32], strides = [1, 1]} : vector<2x128xf32> to vector<2x32xf32>
    %81 = vector.extract_strided_slice %79 {offsets = [0, 32], sizes = [2, 32], strides = [1, 1]} : vector<2x128xf32> to vector<2x32xf32>
    %82 = vector.extract_strided_slice %79 {offsets = [0, 96], sizes = [2, 32], strides = [1, 1]} : vector<2x128xf32> to vector<2x32xf32>
    %83 = vector.extract_strided_slice %74 {offsets = [0, 64], sizes = [2, 32], strides = [1, 1]} : vector<2x128xf32> to vector<2x32xf32>
    %84 = math.tanh %83 : vector<2x32xf32>
    %85 = arith.mulf %81, %50 : vector<2x32xf32>
    %86 = arith.mulf %80, %84 : vector<2x32xf32>
    %87 = arith.addf %85, %86 : vector<2x32xf32>
    %88 = math.tanh %87 : vector<2x32xf32>
    %89 = arith.mulf %82, %88 : vector<2x32xf32>
    %90 = vector.extract_strided_slice %6 {offsets = [0, 2, 0], sizes = [2, 1, 128], strides = [1, 1, 1]} : vector<2x8x128xf32> to vector<2x1x128xf32>
    %91 = vector.shape_cast %90 : vector<2x1x128xf32> to vector<2x128xf32>
    %cst_23 = arith.constant dense<0.000000e+00> : vector<2x128xf32>
    %92 = tpu.matmul %71, %7, %cst_23 {dimension_numbers = #tpu.dot_dimension_numbers<[1], [0], [0], [1], [0, 0, 1, 1], [], []>} : vector<2x32xf32>, vector<32x128xf32>, vector<2x128xf32> -> vector<2x128xf32>
    %93 = arith.addf %91, %92 : vector<2x128xf32>
    %94 = arith.negf %93 : vector<2x128xf32>
    %95 = math.exp %94 : vector<2x128xf32>
    %cst_24 = arith.constant 1.000000e+00 : f32
    %96 = vector.broadcast %cst_24 : f32 to vector<2x128xf32>
    %97 = arith.addf %96, %95 : vector<2x128xf32>
    %98 = arith.divf %96, %97 : vector<2x128xf32>
    %99 = vector.extract_strided_slice %98 {offsets = [0, 0], sizes = [2, 32], strides = [1, 1]} : vector<2x128xf32> to vector<2x32xf32>
    %100 = vector.extract_strided_slice %98 {offsets = [0, 32], sizes = [2, 32], strides = [1, 1]} : vector<2x128xf32> to vector<2x32xf32>
    %101 = vector.extract_strided_slice %98 {offsets = [0, 96], sizes = [2, 32], strides = [1, 1]} : vector<2x128xf32> to vector<2x32xf32>
    %102 = vector.extract_strided_slice %93 {offsets = [0, 64], sizes = [2, 32], strides = [1, 1]} : vector<2x128xf32> to vector<2x32xf32>
    %103 = math.tanh %102 : vector<2x32xf32>
    %104 = arith.mulf %100, %69 : vector<2x32xf32>
    %105 = arith.mulf %99, %103 : vector<2x32xf32>
    %106 = arith.addf %104, %105 : vector<2x32xf32>
    %107 = math.tanh %106 : vector<2x32xf32>
    %108 = arith.mulf %101, %107 : vector<2x32xf32>
    %109 = tpu.concatenate %108, %89 in 1 : vector<2x32xf32>, vector<2x32xf32> -> vector<2x64xf32>
    %cst_25 = arith.constant dense<0.000000e+00> : vector<2x128xf32>
    %110 = tpu.matmul %109, %8, %cst_25 {dimension_numbers = #tpu.dot_dimension_numbers<[1], [0], [0], [1], [0, 0, 1, 1], [], []>} : vector<2x64xf32>, vector<64x128xf32>, vector<2x128xf32> -> vector<2x128xf32>
    %111 = arith.addf %110, %11 : vector<2x128xf32>
    %112 = arith.negf %111 : vector<2x128xf32>
    %113 = math.exp %112 : vector<2x128xf32>
    %cst_26 = arith.constant 1.000000e+00 : f32
    %114 = vector.broadcast %cst_26 : f32 to vector<2x128xf32>
    %115 = arith.addf %114, %113 : vector<2x128xf32>
    %116 = arith.divf %114, %115 : vector<2x128xf32>
    %117 = vector.extract_strided_slice %116 {offsets = [0, 0], sizes = [2, 32], strides = [1, 1]} : vector<2x128xf32> to vector<2x32xf32>
    %118 = vector.extract_strided_slice %116 {offsets = [0, 32], sizes = [2, 32], strides = [1, 1]} : vector<2x128xf32> to vector<2x32xf32>
    %119 = vector.extract_strided_slice %116 {offsets = [0, 96], sizes = [2, 32], strides = [1, 1]} : vector<2x128xf32> to vector<2x32xf32>
    %120 = vector.extract_strided_slice %111 {offsets = [0, 64], sizes = [2, 32], strides = [1, 1]} : vector<2x128xf32> to vector<2x32xf32>
    %121 = math.tanh %120 : vector<2x32xf32>
    %122 = arith.mulf %118, %87 : vector<2x32xf32>
    %123 = arith.mulf %117, %121 : vector<2x32xf32>
    %124 = arith.addf %122, %123 : vector<2x32xf32>
    %125 = math.tanh %124 : vector<2x32xf32>
    %126 = arith.mulf %119, %125 : vector<2x32xf32>
    %127 = vector.extract_strided_slice %6 {offsets = [0, 3, 0], sizes = [2, 1, 128], strides = [1, 1, 1]} : vector<2x8x128xf32> to vector<2x1x128xf32>
    %128 = vector.shape_cast %127 : vector<2x1x128xf32> to vector<2x128xf32>
    %cst_27 = arith.constant dense<0.000000e+00> : vector<2x128xf32>
    %129 = tpu.matmul %108, %7, %cst_27 {dimension_numbers = #tpu.dot_dimension_numbers<[1], [0], [0], [1], [0, 0, 1, 1], [], []>} : vector<2x32xf32>, vector<32x128xf32>, vector<2x128xf32> -> vector<2x128xf32>
    %130 = arith.addf %128, %129 : vector<2x128xf32>
    %131 = arith.negf %130 : vector<2x128xf32>
    %132 = math.exp %131 : vector<2x128xf32>
    %cst_28 = arith.constant 1.000000e+00 : f32
    %133 = vector.broadcast %cst_28 : f32 to vector<2x128xf32>
    %134 = arith.addf %133, %132 : vector<2x128xf32>
    %135 = arith.divf %133, %134 : vector<2x128xf32>
    %136 = vector.extract_strided_slice %135 {offsets = [0, 0], sizes = [2, 32], strides = [1, 1]} : vector<2x128xf32> to vector<2x32xf32>
    %137 = vector.extract_strided_slice %135 {offsets = [0, 32], sizes = [2, 32], strides = [1, 1]} : vector<2x128xf32> to vector<2x32xf32>
    %138 = vector.extract_strided_slice %135 {offsets = [0, 96], sizes = [2, 32], strides = [1, 1]} : vector<2x128xf32> to vector<2x32xf32>
    %139 = vector.extract_strided_slice %130 {offsets = [0, 64], sizes = [2, 32], strides = [1, 1]} : vector<2x128xf32> to vector<2x32xf32>
    %140 = math.tanh %139 : vector<2x32xf32>
    %141 = arith.mulf %137, %106 : vector<2x32xf32>
    %142 = arith.mulf %136, %140 : vector<2x32xf32>
    %143 = arith.addf %141, %142 : vector<2x32xf32>
    %144 = math.tanh %143 : vector<2x32xf32>
    %145 = arith.mulf %138, %144 : vector<2x32xf32>
    %146 = tpu.concatenate %145, %126 in 1 : vector<2x32xf32>, vector<2x32xf32> -> vector<2x64xf32>
    %cst_29 = arith.constant dense<0.000000e+00> : vector<2x128xf32>
    %147 = tpu.matmul %146, %8, %cst_29 {dimension_numbers = #tpu.dot_dimension_numbers<[1], [0], [0], [1], [0, 0, 1, 1], [], []>} : vector<2x64xf32>, vector<64x128xf32>, vector<2x128xf32> -> vector<2x128xf32>
    %148 = arith.addf %147, %11 : vector<2x128xf32>
    %149 = arith.negf %148 : vector<2x128xf32>
    %150 = math.exp %149 : vector<2x128xf32>
    %cst_30 = arith.constant 1.000000e+00 : f32
    %151 = vector.broadcast %cst_30 : f32 to vector<2x128xf32>
    %152 = arith.addf %151, %150 : vector<2x128xf32>
    %153 = arith.divf %151, %152 : vector<2x128xf32>
    %154 = vector.extract_strided_slice %153 {offsets = [0, 0], sizes = [2, 32], strides = [1, 1]} : vector<2x128xf32> to vector<2x32xf32>
    %155 = vector.extract_strided_slice %153 {offsets = [0, 32], sizes = [2, 32], strides = [1, 1]} : vector<2x128xf32> to vector<2x32xf32>
    %156 = vector.extract_strided_slice %153 {offsets = [0, 96], sizes = [2, 32], strides = [1, 1]} : vector<2x128xf32> to vector<2x32xf32>
    %157 = vector.extract_strided_slice %148 {offsets = [0, 64], sizes = [2, 32], strides = [1, 1]} : vector<2x128xf32> to vector<2x32xf32>
    %158 = math.tanh %157 : vector<2x32xf32>
    %159 = arith.mulf %155, %124 : vector<2x32xf32>
    %160 = arith.mulf %154, %158 : vector<2x32xf32>
    %161 = arith.addf %159, %160 : vector<2x32xf32>
    %162 = math.tanh %161 : vector<2x32xf32>
    %163 = arith.mulf %156, %162 : vector<2x32xf32>
    %164 = vector.extract_strided_slice %6 {offsets = [0, 4, 0], sizes = [2, 1, 128], strides = [1, 1, 1]} : vector<2x8x128xf32> to vector<2x1x128xf32>
    %165 = vector.shape_cast %164 : vector<2x1x128xf32> to vector<2x128xf32>
    %cst_31 = arith.constant dense<0.000000e+00> : vector<2x128xf32>
    %166 = tpu.matmul %145, %7, %cst_31 {dimension_numbers = #tpu.dot_dimension_numbers<[1], [0], [0], [1], [0, 0, 1, 1], [], []>} : vector<2x32xf32>, vector<32x128xf32>, vector<2x128xf32> -> vector<2x128xf32>
    %167 = arith.addf %165, %166 : vector<2x128xf32>
    %168 = arith.negf %167 : vector<2x128xf32>
    %169 = math.exp %168 : vector<2x128xf32>
    %cst_32 = arith.constant 1.000000e+00 : f32
    %170 = vector.broadcast %cst_32 : f32 to vector<2x128xf32>
    %171 = arith.addf %170, %169 : vector<2x128xf32>
    %172 = arith.divf %170, %171 : vector<2x128xf32>
    %173 = vector.extract_strided_slice %172 {offsets = [0, 0], sizes = [2, 32], strides = [1, 1]} : vector<2x128xf32> to vector<2x32xf32>
    %174 = vector.extract_strided_slice %172 {offsets = [0, 32], sizes = [2, 32], strides = [1, 1]} : vector<2x128xf32> to vector<2x32xf32>
    %175 = vector.extract_strided_slice %172 {offsets = [0, 96], sizes = [2, 32], strides = [1, 1]} : vector<2x128xf32> to vector<2x32xf32>
    %176 = vector.extract_strided_slice %167 {offsets = [0, 64], sizes = [2, 32], strides = [1, 1]} : vector<2x128xf32> to vector<2x32xf32>
    %177 = math.tanh %176 : vector<2x32xf32>
    %178 = arith.mulf %174, %143 : vector<2x32xf32>
    %179 = arith.mulf %173, %177 : vector<2x32xf32>
    %180 = arith.addf %178, %179 : vector<2x32xf32>
    %181 = math.tanh %180 : vector<2x32xf32>
    %182 = arith.mulf %175, %181 : vector<2x32xf32>
    %183 = tpu.concatenate %182, %163 in 1 : vector<2x32xf32>, vector<2x32xf32> -> vector<2x64xf32>
    %cst_33 = arith.constant dense<0.000000e+00> : vector<2x128xf32>
    %184 = tpu.matmul %183, %8, %cst_33 {dimension_numbers = #tpu.dot_dimension_numbers<[1], [0], [0], [1], [0, 0, 1, 1], [], []>} : vector<2x64xf32>, vector<64x128xf32>, vector<2x128xf32> -> vector<2x128xf32>
    %185 = arith.addf %184, %11 : vector<2x128xf32>
    %186 = arith.negf %185 : vector<2x128xf32>
    %187 = math.exp %186 : vector<2x128xf32>
    %cst_34 = arith.constant 1.000000e+00 : f32
    %188 = vector.broadcast %cst_34 : f32 to vector<2x128xf32>
    %189 = arith.addf %188, %187 : vector<2x128xf32>
    %190 = arith.divf %188, %189 : vector<2x128xf32>
    %191 = vector.extract_strided_slice %190 {offsets = [0, 0], sizes = [2, 32], strides = [1, 1]} : vector<2x128xf32> to vector<2x32xf32>
    %192 = vector.extract_strided_slice %190 {offsets = [0, 32], sizes = [2, 32], strides = [1, 1]} : vector<2x128xf32> to vector<2x32xf32>
    %193 = vector.extract_strided_slice %190 {offsets = [0, 96], sizes = [2, 32], strides = [1, 1]} : vector<2x128xf32> to vector<2x32xf32>
    %194 = vector.extract_strided_slice %185 {offsets = [0, 64], sizes = [2, 32], strides = [1, 1]} : vector<2x128xf32> to vector<2x32xf32>
    %195 = math.tanh %194 : vector<2x32xf32>
    %196 = arith.mulf %192, %161 : vector<2x32xf32>
    %197 = arith.mulf %191, %195 : vector<2x32xf32>
    %198 = arith.addf %196, %197 : vector<2x32xf32>
    %199 = math.tanh %198 : vector<2x32xf32>
    %200 = arith.mulf %193, %199 : vector<2x32xf32>
    %201 = vector.extract_strided_slice %6 {offsets = [0, 5, 0], sizes = [2, 1, 128], strides = [1, 1, 1]} : vector<2x8x128xf32> to vector<2x1x128xf32>
    %202 = vector.shape_cast %201 : vector<2x1x128xf32> to vector<2x128xf32>
    %cst_35 = arith.constant dense<0.000000e+00> : vector<2x128xf32>
    %203 = tpu.matmul %182, %7, %cst_35 {dimension_numbers = #tpu.dot_dimension_numbers<[1], [0], [0], [1], [0, 0, 1, 1], [], []>} : vector<2x32xf32>, vector<32x128xf32>, vector<2x128xf32> -> vector<2x128xf32>
    %204 = arith.addf %202, %203 : vector<2x128xf32>
    %205 = arith.negf %204 : vector<2x128xf32>
    %206 = math.exp %205 : vector<2x128xf32>
    %cst_36 = arith.constant 1.000000e+00 : f32
    %207 = vector.broadcast %cst_36 : f32 to vector<2x128xf32>
    %208 = arith.addf %207, %206 : vector<2x128xf32>
    %209 = arith.divf %207, %208 : vector<2x128xf32>
    %210 = vector.extract_strided_slice %209 {offsets = [0, 0], sizes = [2, 32], strides = [1, 1]} : vector<2x128xf32> to vector<2x32xf32>
    %211 = vector.extract_strided_slice %209 {offsets = [0, 32], sizes = [2, 32], strides = [1, 1]} : vector<2x128xf32> to vector<2x32xf32>
    %212 = vector.extract_strided_slice %209 {offsets = [0, 96], sizes = [2, 32], strides = [1, 1]} : vector<2x128xf32> to vector<2x32xf32>
    %213 = vector.extract_strided_slice %204 {offsets = [0, 64], sizes = [2, 32], strides = [1, 1]} : vector<2x128xf32> to vector<2x32xf32>
    %214 = math.tanh %213 : vector<2x32xf32>
    %215 = arith.mulf %211, %180 : vector<2x32xf32>
    %216 = arith.mulf %210, %214 : vector<2x32xf32>
    %217 = arith.addf %215, %216 : vector<2x32xf32>
    %218 = math.tanh %217 : vector<2x32xf32>
    %219 = arith.mulf %212, %218 : vector<2x32xf32>
    %220 = tpu.concatenate %219, %200 in 1 : vector<2x32xf32>, vector<2x32xf32> -> vector<2x64xf32>
    %cst_37 = arith.constant dense<0.000000e+00> : vector<2x128xf32>
    %221 = tpu.matmul %220, %8, %cst_37 {dimension_numbers = #tpu.dot_dimension_numbers<[1], [0], [0], [1], [0, 0, 1, 1], [], []>} : vector<2x64xf32>, vector<64x128xf32>, vector<2x128xf32> -> vector<2x128xf32>
    %222 = arith.addf %221, %11 : vector<2x128xf32>
    %223 = arith.negf %222 : vector<2x128xf32>
    %224 = math.exp %223 : vector<2x128xf32>
    %cst_38 = arith.constant 1.000000e+00 : f32
    %225 = vector.broadcast %cst_38 : f32 to vector<2x128xf32>
    %226 = arith.addf %225, %224 : vector<2x128xf32>
    %227 = arith.divf %225, %226 : vector<2x128xf32>
    %228 = vector.extract_strided_slice %227 {offsets = [0, 0], sizes = [2, 32], strides = [1, 1]} : vector<2x128xf32> to vector<2x32xf32>
    %229 = vector.extract_strided_slice %227 {offsets = [0, 32], sizes = [2, 32], strides = [1, 1]} : vector<2x128xf32> to vector<2x32xf32>
    %230 = vector.extract_strided_slice %227 {offsets = [0, 96], sizes = [2, 32], strides = [1, 1]} : vector<2x128xf32> to vector<2x32xf32>
    %231 = vector.extract_strided_slice %222 {offsets = [0, 64], sizes = [2, 32], strides = [1, 1]} : vector<2x128xf32> to vector<2x32xf32>
    %232 = math.tanh %231 : vector<2x32xf32>
    %233 = arith.mulf %229, %198 : vector<2x32xf32>
    %234 = arith.mulf %228, %232 : vector<2x32xf32>
    %235 = arith.addf %233, %234 : vector<2x32xf32>
    %236 = math.tanh %235 : vector<2x32xf32>
    %237 = arith.mulf %230, %236 : vector<2x32xf32>
    %238 = vector.extract_strided_slice %6 {offsets = [0, 6, 0], sizes = [2, 1, 128], strides = [1, 1, 1]} : vector<2x8x128xf32> to vector<2x1x128xf32>
    %239 = vector.shape_cast %238 : vector<2x1x128xf32> to vector<2x128xf32>
    %cst_39 = arith.constant dense<0.000000e+00> : vector<2x128xf32>
    %240 = tpu.matmul %219, %7, %cst_39 {dimension_numbers = #tpu.dot_dimension_numbers<[1], [0], [0], [1], [0, 0, 1, 1], [], []>} : vector<2x32xf32>, vector<32x128xf32>, vector<2x128xf32> -> vector<2x128xf32>
    %241 = arith.addf %239, %240 : vector<2x128xf32>
    %242 = arith.negf %241 : vector<2x128xf32>
    %243 = math.exp %242 : vector<2x128xf32>
    %cst_40 = arith.constant 1.000000e+00 : f32
    %244 = vector.broadcast %cst_40 : f32 to vector<2x128xf32>
    %245 = arith.addf %244, %243 : vector<2x128xf32>
    %246 = arith.divf %244, %245 : vector<2x128xf32>
    %247 = vector.extract_strided_slice %246 {offsets = [0, 0], sizes = [2, 32], strides = [1, 1]} : vector<2x128xf32> to vector<2x32xf32>
    %248 = vector.extract_strided_slice %246 {offsets = [0, 32], sizes = [2, 32], strides = [1, 1]} : vector<2x128xf32> to vector<2x32xf32>
    %249 = vector.extract_strided_slice %246 {offsets = [0, 96], sizes = [2, 32], strides = [1, 1]} : vector<2x128xf32> to vector<2x32xf32>
    %250 = vector.extract_strided_slice %241 {offsets = [0, 64], sizes = [2, 32], strides = [1, 1]} : vector<2x128xf32> to vector<2x32xf32>
    %251 = math.tanh %250 : vector<2x32xf32>
    %252 = arith.mulf %248, %217 : vector<2x32xf32>
    %253 = arith.mulf %247, %251 : vector<2x32xf32>
    %254 = arith.addf %252, %253 : vector<2x32xf32>
    %255 = math.tanh %254 : vector<2x32xf32>
    %256 = arith.mulf %249, %255 : vector<2x32xf32>
    %257 = tpu.concatenate %256, %237 in 1 : vector<2x32xf32>, vector<2x32xf32> -> vector<2x64xf32>
    %cst_41 = arith.constant dense<0.000000e+00> : vector<2x128xf32>
    %258 = tpu.matmul %257, %8, %cst_41 {dimension_numbers = #tpu.dot_dimension_numbers<[1], [0], [0], [1], [0, 0, 1, 1], [], []>} : vector<2x64xf32>, vector<64x128xf32>, vector<2x128xf32> -> vector<2x128xf32>
    %259 = arith.addf %258, %11 : vector<2x128xf32>
    %260 = arith.negf %259 : vector<2x128xf32>
    %261 = math.exp %260 : vector<2x128xf32>
    %cst_42 = arith.constant 1.000000e+00 : f32
    %262 = vector.broadcast %cst_42 : f32 to vector<2x128xf32>
    %263 = arith.addf %262, %261 : vector<2x128xf32>
    %264 = arith.divf %262, %263 : vector<2x128xf32>
    %265 = vector.extract_strided_slice %264 {offsets = [0, 0], sizes = [2, 32], strides = [1, 1]} : vector<2x128xf32> to vector<2x32xf32>
    %266 = vector.extract_strided_slice %264 {offsets = [0, 32], sizes = [2, 32], strides = [1, 1]} : vector<2x128xf32> to vector<2x32xf32>
    %267 = vector.extract_strided_slice %264 {offsets = [0, 96], sizes = [2, 32], strides = [1, 1]} : vector<2x128xf32> to vector<2x32xf32>
    %268 = vector.extract_strided_slice %259 {offsets = [0, 64], sizes = [2, 32], strides = [1, 1]} : vector<2x128xf32> to vector<2x32xf32>
    %269 = math.tanh %268 : vector<2x32xf32>
    %270 = arith.mulf %266, %235 : vector<2x32xf32>
    %271 = arith.mulf %265, %269 : vector<2x32xf32>
    %272 = arith.addf %270, %271 : vector<2x32xf32>
    %273 = math.tanh %272 : vector<2x32xf32>
    %274 = arith.mulf %267, %273 : vector<2x32xf32>
    %275 = vector.extract_strided_slice %6 {offsets = [0, 7, 0], sizes = [2, 1, 128], strides = [1, 1, 1]} : vector<2x8x128xf32> to vector<2x1x128xf32>
    %276 = vector.shape_cast %275 : vector<2x1x128xf32> to vector<2x128xf32>
    %cst_43 = arith.constant dense<0.000000e+00> : vector<2x128xf32>
    %277 = tpu.matmul %256, %7, %cst_43 {dimension_numbers = #tpu.dot_dimension_numbers<[1], [0], [0], [1], [0, 0, 1, 1], [], []>} : vector<2x32xf32>, vector<32x128xf32>, vector<2x128xf32> -> vector<2x128xf32>
    %278 = arith.addf %276, %277 : vector<2x128xf32>
    %279 = arith.negf %278 : vector<2x128xf32>
    %280 = math.exp %279 : vector<2x128xf32>
    %cst_44 = arith.constant 1.000000e+00 : f32
    %281 = vector.broadcast %cst_44 : f32 to vector<2x128xf32>
    %282 = arith.addf %281, %280 : vector<2x128xf32>
    %283 = arith.divf %281, %282 : vector<2x128xf32>
    %284 = vector.extract_strided_slice %283 {offsets = [0, 0], sizes = [2, 32], strides = [1, 1]} : vector<2x128xf32> to vector<2x32xf32>
    %285 = vector.extract_strided_slice %283 {offsets = [0, 32], sizes = [2, 32], strides = [1, 1]} : vector<2x128xf32> to vector<2x32xf32>
    %286 = vector.extract_strided_slice %283 {offsets = [0, 96], sizes = [2, 32], strides = [1, 1]} : vector<2x128xf32> to vector<2x32xf32>
    %287 = vector.extract_strided_slice %278 {offsets = [0, 64], sizes = [2, 32], strides = [1, 1]} : vector<2x128xf32> to vector<2x32xf32>
    %288 = math.tanh %287 : vector<2x32xf32>
    %289 = arith.mulf %285, %254 : vector<2x32xf32>
    %290 = arith.mulf %284, %288 : vector<2x32xf32>
    %291 = arith.addf %289, %290 : vector<2x32xf32>
    %292 = math.tanh %291 : vector<2x32xf32>
    %293 = arith.mulf %286, %292 : vector<2x32xf32>
    %294 = tpu.concatenate %293, %274 in 1 : vector<2x32xf32>, vector<2x32xf32> -> vector<2x64xf32>
    %cst_45 = arith.constant dense<0.000000e+00> : vector<2x128xf32>
    %295 = tpu.matmul %294, %8, %cst_45 {dimension_numbers = #tpu.dot_dimension_numbers<[1], [0], [0], [1], [0, 0, 1, 1], [], []>} : vector<2x64xf32>, vector<64x128xf32>, vector<2x128xf32> -> vector<2x128xf32>
    %296 = arith.addf %295, %11 : vector<2x128xf32>
    %297 = arith.negf %296 : vector<2x128xf32>
    %298 = math.exp %297 : vector<2x128xf32>
    %cst_46 = arith.constant 1.000000e+00 : f32
    %299 = vector.broadcast %cst_46 : f32 to vector<2x128xf32>
    %300 = arith.addf %299, %298 : vector<2x128xf32>
    %301 = arith.divf %299, %300 : vector<2x128xf32>
    %302 = vector.extract_strided_slice %301 {offsets = [0, 0], sizes = [2, 32], strides = [1, 1]} : vector<2x128xf32> to vector<2x32xf32>
    %303 = vector.extract_strided_slice %301 {offsets = [0, 32], sizes = [2, 32], strides = [1, 1]} : vector<2x128xf32> to vector<2x32xf32>
    %304 = vector.extract_strided_slice %301 {offsets = [0, 96], sizes = [2, 32], strides = [1, 1]} : vector<2x128xf32> to vector<2x32xf32>
    %305 = vector.extract_strided_slice %296 {offsets = [0, 64], sizes = [2, 32], strides = [1, 1]} : vector<2x128xf32> to vector<2x32xf32>
    %306 = math.tanh %305 : vector<2x32xf32>
    %307 = arith.mulf %303, %272 : vector<2x32xf32>
    %308 = arith.mulf %302, %306 : vector<2x32xf32>
    %309 = arith.addf %307, %308 : vector<2x32xf32>
    %310 = math.tanh %309 : vector<2x32xf32>
    %311 = arith.mulf %304, %310 : vector<2x32xf32>
    %312 = tpu.concatenate %52, %89, %126, %163, %200, %237, %274, %311 in 1 : vector<2x32xf32>, vector<2x32xf32>, vector<2x32xf32>, vector<2x32xf32>, vector<2x32xf32>, vector<2x32xf32>, vector<2x32xf32>, vector<2x32xf32> -> vector<2x256xf32>
    %c0_47 = arith.constant 0 : index
    %c0_48 = arith.constant 0 : index
    %313 = vector.load %arg7[%c0_47, %c0_48] : memref<2x256xf32, #tpu.memory_space<vmem>>, vector<2x256xf32>
    tpu.vector_store %arg7[%c0_47, %c0_48], %312 {strides = array<i32>} : memref<2x256xf32, #tpu.memory_space<vmem>>, vector<2x256xf32>,
    %314 = tpu.concatenate %293, %311, %291, %309 in 1 : vector<2x32xf32>, vector<2x32xf32>, vector<2x32xf32>, vector<2x32xf32> -> vector<2x128xf32>
    %c0_49 = arith.constant 0 : index
    %c0_50 = arith.constant 0 : index
    %315 = vector.load %arg8[%c0_49, %c0_50] : memref<2x128xf32, #tpu.memory_space<vmem>>, vector<2x128xf32>
    tpu.vector_store %arg8[%c0_49, %c0_50], %314 {strides = array<i32>} : memref<2x128xf32, #tpu.memory_space<vmem>>, vector<2x128xf32>,
    return
  }
  func.func @transform_0(%arg0: i32) -> (i32, i32) {
    %c0_i32 = arith.constant 0 : i32
    %c0_i32_0 = arith.constant 0 : i32
    %c0_i32_1 = arith.constant 0 : i32
    return %c0_i32, %c0_i32_0 : i32, i32
  }
  func.func @transform_1(%arg0: i32) -> (i32, i32) {
    %c0_i32 = arith.constant 0 : i32
    %c0_i32_0 = arith.constant 0 : i32
    %c0_i32_1 = arith.constant 0 : i32
    return %c0_i32, %c0_i32_0 : i32, i32
  }
  func.func @transform_2(%arg0: i32) -> (i32, i32) {
    %c0_i32 = arith.constant 0 : i32
    %c0_i32_0 = arith.constant 0 : i32
    %c0_i32_1 = arith.constant 0 : i32
    return %c0_i32, %c0_i32_0 : i32, i32
  }
  func.func @transform_3(%arg0: i32) -> (i32, i32) {
    %c0_i32 = arith.constant 0 : i32
    %c0_i32_0 = arith.constant 0 : i32
    %c0_i32_1 = arith.constant 0 : i32
    return %c0_i32, %c0_i32_0 : i32, i32
  }
  func.func @transform_4(%arg0: i32) -> (i32, i32) {
    %c0_i32 = arith.constant 0 : i32
    %c0_i32_0 = arith.constant 0 : i32
    %c0_i32_1 = arith.constant 0 : i32
    return %c0_i32, %c0_i32_0 : i32, i32
  }
  func.func @transform_5(%arg0: i32) -> (i32, i32) {
    %c0_i32 = arith.constant 0 : i32
    %c0_i32_0 = arith.constant 0 : i32
    %c0_i32_1 = arith.constant 0 : i32
    return %c0_i32, %c0_i32_0 : i32, i32
  }
  func.func @transform_6(%arg0: i32) -> (i32, i32) {
    %c0_i32 = arith.constant 0 : i32
    %c0_i32_0 = arith.constant 0 : i32
    %c0_i32_1 = arith.constant 0 : i32
    return %c0_i32, %c0_i32_0 : i32, i32
  }
  func.func @transform_7(%arg0: i32) -> (i32, i32) {
    %c0_i32 = arith.constant 0 : i32
    %c0_i32_0 = arith.constant 0 : i32
    %c0_i32_1 = arith.constant 0 : i32
    return %c0_i32, %c0_i32_0 : i32, i32
  }
}

</mosaic_0001>

<bundles_post_ra>
// kernel: simple_lstm_forward.1
= control target key start
LH: loop header
LB: loop body
LE: loop exit
PB: predicated region body
PF: predicated region fallthrough
CT: control target
= control target key end

     0   :  { %13 = vsyncpa [#allocation3], 0  ;;  %s3619_s0 = inlined_call_operand.hbm [shape: f32[16,16], index: 0, kind: input, shape index: {}]   ;;  %s3620_s1 = inlined_call_operand.hbm [shape: f32[16,128], index: 1, kind: input, shape index: {}]   ;;  %s3621_s2 = inlined_call_operand.hbm [shape: f32[32,128], index: 2, kind: input, shape index: {}]   ;;  %s3622_s3 = inlined_call_operand.vmem [shape: f32[1,128], index: 3, kind: input, shape index: {}]   ;;  %s3623_s4 = inlined_call_operand.hbm [shape: f32[64,128], index: 4, kind: input, shape index: {}]   ;;  %s3624_s5 = inlined_call_operand.vmem [shape: f32[1,128], index: 5, kind: input, shape index: {}]   ;;  %s3625_s6 = inlined_call_operand.vmem [shape: f32[2,256], index: 6, kind: output, shape index: {0}]   ;;  %s3626_s7 = inlined_call_operand.vmem [shape: f32[2,128], index: 7, kind: output, shape index: {1}]  }
   0x1   :  { %14 = vsyncpa [#allocation5], 0 }
   0x2   :  { %15 = vsyncpa [#allocation8], 0  ;;  %s2960_s24 = smov [#allocation4]   ;;  %s2961_s26 = smov [#allocation2]  }
   0x3   :  { %s33_s25 = sshll.u32 %s2960_s24, 4  ;;  %s21_s27 = sshll.u32 %s2961_s26, 4  ;;  %s34_s25 = int_to_ptr.vmem [resolvable:$true] %s33_s25  ;;  %s22_s27 = int_to_ptr.vmem [resolvable:$true] %s21_s27 }
   0x4   :  { %s2882_s28 = scalar_lea.vmem %s34_s25, 256  ;;  %p2887_p1 = scmp.lt.s32.totalorder %s34_s25, %s34_s25 }
   0x5   :  { %p2883_p0 = scmp.ne.s32.totalorder %s34_s25, %s2882_s28  ;;  %p2888_p2 = scmp.lt.s32.totalorder %s2882_s28, %s2882_s28 }
   0x7   :  { %p2889_p3 = por %p2888_p2, %p2887_p1 }
   0x9   :  { %p2890_p4 = pnand %p2889_p3, %p2883_p0 }
   0xb   :  { %2893 = shalt.err (!%p2890_p4)
}
   0xc   :  { %s2962_s29 = smov 128   ;;  %s2963_s30 = smov 8  }
   0xd   :  { %39 = dma.hbm_to_vmem [thread:$0]  %s3620_s1, 256, %s34_s25, [#allocation5], %s2962_s29, %s2962_s29, %s2963_s30  }
   0xe   :  { %s2902_s10 = scalar_lea.vmem %s22_s27, 256  ;;  %p2907_p6 = scmp.lt.s32.totalorder %s22_s27, %s22_s27 }
   0xf   :  { %p2903_p5 = scmp.ne.s32.totalorder %s22_s27, %s2902_s10  ;;  %p2908_p7 = scmp.lt.s32.totalorder %s2902_s10, %s2902_s10 }
  0x11   :  { %p2909_p8 = por %p2908_p7, %p2907_p6 }
  0x13   :  { %p2910_p9 = pnand %p2909_p8, %p2903_p5 }
  0x15   :  { %2913 = shalt.err (!%p2910_p9)
}
  0x16   :  { %27 = dma.hbm_to_vmem [thread:$0]  %s3619_s0, 256, %s22_s27, [#allocation3], %s2962_s29, %s2962_s29, %s2963_s30  }
  0x17   :  { %s2964_s13 = smov [#allocation6]   ;;  %s2965_s15 = smov [#allocation7]  }
  0x18   :  { %s45_s14 = sshll.u32 %s2964_s13, 4  ;;  %s59_s16 = sshll.u32 %s2965_s15, 4  ;;  %s46_s14 = int_to_ptr.vmem [resolvable:$true] %s45_s14  ;;  %s60_s16 = int_to_ptr.vmem [resolvable:$true] %s59_s16 }
  0x19   :  { %s2922_s1 = scalar_lea.vmem %s46_s14, 512  ;;  %p2927_p11 = scmp.lt.s32.totalorder %s46_s14, %s46_s14 }
  0x1a   :  { %p2923_p10 = scmp.ne.s32.totalorder %s46_s14, %s2922_s1  ;;  %p2928_p12 = scmp.lt.s32.totalorder %s2922_s1, %s2922_s1 }
  0x1c   :  { %p2929_p13 = por %p2928_p12, %p2927_p11 }
  0x1e   :  { %p2930_p0 = pnand %p2929_p13, %p2923_p10 }
  0x20   :  { %2933 = shalt.err (!%p2930_p0)
}
  0x21   :  { %51 = dma.hbm_to_vmem [thread:$0]  %s3621_s2, 512, %s46_s14, [#allocation5], %s2962_s29, %s2962_s29, %s2963_s30  }
  0x22   :  { %s2942_s0 = scalar_lea.vmem %s60_s16, 1024  ;;  %p2947_p2 = scmp.lt.s32.totalorder %s60_s16, %s60_s16 }
  0x23   :  { %p2943_p1 = scmp.ne.s32.totalorder %s60_s16, %s2942_s0  ;;  %p2948_p3 = scmp.lt.s32.totalorder %s2942_s0, %s2942_s0 }
  0x25   :  { %p2949_p4 = por %p2948_p3, %p2947_p2 }
  0x27   :  { %p2950_p5 = pnand %p2949_p4, %p2943_p1 }
  0x29   :  { %2953 = shalt.err (!%p2950_p5)
}
  0x2a   :  { %65 = dma.hbm_to_vmem [thread:$0]  %s3623_s4, 1024, %s60_s16, [#allocation8], %s2962_s29, %s2962_s29, %s2963_s30  }
  0x2b   :  { %2954 = dma.done.wait [#allocation3], 256  }
  0x2c   :  { %2955 = vsyncadd [#allocation3], 4294967040 }
  0x2d   :  { %2956 = dma.done.wait [#allocation5], 768  }
  0x2e   :  { %2957 = vsyncadd [#allocation5], 4294966528 }
  0x2f   :  { %2958 = dma.done.wait [#allocation8], 1024  }
  0x30   :  { %2959 = vsyncadd [#allocation8], 4294966272  ;;  %v2966_v0 = vmov 0.0   ;;  %vm2967_vm0 = vmmov 0   ;;  %vm91_vm1 = vcmask 130048   ;;  %v83_v1 = vld [vmem:[#allocation4 + $0x8] sm:$0xff] }
  0x31   :  { %2448 = vmatprep.subr.mxu1 %v2966_v0  ;;  %2456 = vmatprep.mubr.msk.f32.mxu1 %vm2967_vm0, %v2966_v0  ;;  %v82_v2 = vld [vmem:[#allocation4] sm:$0xff]  ;;  %v80_v3 = vld [vmem:[#allocation2] sm:$0xff]  ;;  %v3038_v4 = vld [vmem:[#allocation6 + $0x18] sm:$0xff]  ;;  %s2968_s21 = smov 64   ;;  %vm323_vm2 = vcmask 1041409   ;;  %vm192_vm3 = vcmask 261120  }
  0x32   :  { %2411 = vmatprep.subr.mxu0 %v83_v1  ;;  %2415 = vmatprep.mubr.msk.f32.mxu0 %vm91_vm1, %v80_v3  ;;  %v81_v5 = vld [vmem:[#allocation2 + $0x8] sm:$0xff]  ;;  %v3041_v6 = vld [vmem:[#allocation6 + $0x10] sm:$0xff]  ;;  %v3056_v8 = vld [vmem:[#allocation6] sm:$0xff]  ;;  %vm329_vm4 = vcmask 523264   ;;  %vm562_vm5 = vcmask 1042434   ;;  %vm811_vm6 = vcmask 1043459  }
  0x33   :  { %2412 = vmatpush3.msra.mxu0 %v83_v1  ;;  %2449 = vmatpush3.msra.mxu1 %v3038_v4  ;;  %v3050_v7 = vld [vmem:[#allocation6 + $0x8] sm:$0xff]  ;;  %v2251_v10 = vld [vmem:[%s3622_s3] ss:$0 sm:$0xff]  ;;  %s2969_s3 = smov 32   ;;  %v3087_v39 = vld [vmem:[#allocation7 + $0x38] sm:$0xff]  ;;  %vm1061_vm7 = vcmask 1044484  }
  0x34   :  { %2413 = vmatprep.subr.mxu0 %v82_v2  ;;  %2450 = vmatprep.subr.mxu1 %v2966_v0  ;;  %v3089_v40 = vld [vmem:[#allocation7 + $0x30] sm:$0xff]  ;;  %v3093_v41 = vld [vmem:[#allocation7 + $0x28] sm:$0xff]  ;;  %v3097_v42 = vld [vmem:[#allocation7 + $0x20] sm:$0xff]  ;;  %vm1311_vm8 = vcmask 1045509   ;;  %vm1561_vm9 = vcmask 1046534   ;;  %vm1811_vm10 = vcmask 1047559  }
  0x35   :  { %2414 = vmatpush3.msra.mxu0 %v82_v2  ;;  %2451 = vmatpush3.msra.mxu1 %v3041_v6  ;;  %v3102_v44 = vld [vmem:[#allocation7 + $0x18] sm:$0xff]  ;;  %v3106_v45 = vld [vmem:[#allocation7 + $0x10] sm:$0xff]  ;;  %v3111_v47 = vld [vmem:[#allocation7 + $0x8] sm:$0xff]  ;;  %vm2076_vm11 = vcmask 1040384   ;;  %vm2196_vm12 = vcmask 785408  }
  0x36   :  { %2416 = vmatmul.mubr.msk.f32.vlgmr.msra.gmra.mxu0 %vm91_vm1, %v81_v5  ;;  %2418 = vmatprep.subr.mxu0 %v2966_v0  ;;  %v3117_v48 = vld [vmem:[#allocation7] sm:$0xff] }
  0x37   :  { %2419 = vmatpush3.msra.mxu0 %v3038_v4  ;;  %2426 = vmatprep.mubr.msk.f32.mxu0 %vm2967_vm0, %v2966_v0  ;;  %v3159_v63 = vld [vmem:[%s3624_s5] ss:$0 sm:$0xff] }
  0x38   :  { %2420 = vmatprep.subr.mxu0 %v2966_v0  ;;  %2452 = vmatprep.subr.mxu1 %v2966_v0 }
  0x39   :  { %2421 = vmatpush3.msra.mxu0 %v3041_v6  ;;  %2453 = vmatpush3.msra.mxu1 %v3050_v7 }
  0x3a   :  { %2422 = vmatprep.subr.mxu0 %v2966_v0  ;;  %2454 = vmatprep.subr.mxu1 %v2966_v0 }
  0x3b   :  { %2423 = vmatpush3.msra.mxu0 %v3050_v7  ;;  %2455 = vmatpush3.msra.mxu1 %v3056_v8 }
  0x3c   :  { %2424 = vmatprep.subr.mxu0 %v2966_v0  ;;  %2459 = vmatprep.subr.mxu1 %v2966_v0 }
  0x3d   :  { %2425 = vmatpush3.msra.mxu0 %v3056_v8 }
  0x3e   :  { %2427 = vmatmul.mubr.f32.vlgmr.msra.gmra.mxu0 %v2966_v0  ;;  %2429 = vmatprep.subr.mxu0 %v2966_v0 }
  0x3f   :  { %2445 = vmatprep.mubr.msk.f32.mxu0 %vm2967_vm0, %v2966_v0  ;;  %2430 = vmatpush3.msra.mxu0 %v3087_v39 }
  0x40   :  { %2431 = vmatprep.subr.mxu0 %v2966_v0 }
  0x41   :  { %2432 = vmatpush3.msra.mxu0 %v3089_v40 }
  0x42   :  { %2433 = vmatprep.subr.mxu0 %v2966_v0 }
  0x43   :  { %2434 = vmatpush3.msra.mxu0 %v3093_v41 }
  0x44   :  { %2435 = vmatprep.subr.mxu0 %v2966_v0 }
  0x45   :  { %2436 = vmatpush3.msra.mxu0 %v3097_v42 }
  0x46   :  { %2437 = vmatprep.subr.mxu0 %v2966_v0 }
  0x47   :  { %2438 = vmatpush3.msra.mxu0 %v3102_v44 }
  0x48   :  { %2439 = vmatprep.subr.mxu0 %v2966_v0 }
  0x49   :  { %2440 = vmatpush3.msra.mxu0 %v3106_v45 }
  0x4a   :  { %2441 = vmatprep.subr.mxu0 %v2966_v0 }
  0x4b   :  { %2442 = vmatpush3.msra.mxu0 %v3111_v47 }
  0x4c   :  { %2443 = vmatprep.subr.mxu0 %v2966_v0 }
  0x4d   :  { %2444 = vmatpush3.msra.mxu0 %v3117_v48 }
  0x4e   :  { %2478 = vmatprep.subr.mxu0 %v2966_v0 }
  0xf6   :  { %v2417_v9 = vpop.f32.mrf.mxu0 }
  0xf7   :  { %v3071_v13 = vadd.f32 %v2417_v9, %v2251_v10 }
  0xf8   :  { %v164_v11 = vpop.f32.mrf.mxu0 }
  0xf9   :  { %v3074_v17 = vadd.f32 %v2251_v10, %v164_v11 }
  0xfe   :  { %v262_v12 = vpop.f32.mrf.mxu0 }
  0xff   :  { %v267_v14 = vrot.slane %v262_v12, 1  ;;  %v270_v18 = vadd.f32 %v262_v12, %v3074_v17 }
 0x100   :  { %v2428_v15 = vpop.f32.mrf.mxu0 }
 0x101   :  { %v271_v16 = vadd.f32 %v267_v14, %v3071_v13  ;;  %v2255_v22 = vmul.f32 -1.442695, %v270_v18 }
 0x103   :  { %2669 = vtanh.f32 %v271_v16  ;;  %v2256_v21 = vmul.f32 -1.442695, %v271_v16 }
 0x104   :  { %2671 = vtanh.f32 %v270_v18 }
 0x105   :  { %2673 = vpow2.f32 %v2256_v21 }
 0x106   :  { %2675 = vpow2.f32 %v2255_v22 }
 0x110   :  { %v2670_v19 = vpop.eup %2669 }
 0x111   :  { %292 = vrot.lane.b32.xlu0 %v2670_v19, %s2968_s21  ;;  %v2672_v20 = vpop.eup %2671 }
 0x112   :  { %v2674_v23 = vpop.eup %2673 }
 0x113   :  { %v279_v24 = vadd.f32 1.0, %v2674_v23  ;;  %v2676_v25 = vpop.eup %2675 }
 0x114   :  { %v278_v26 = vadd.f32 1.0, %v2676_v25 }
 0x115   :  { %290 = vrot.lane.b32.xlu0 %v2672_v20, %s2968_s21  ;;  %2677 = vrcp.f32 %v279_v24 }
 0x116   :  { %2679 = vrcp.f32 %v278_v26 }
 0x122   :  { %v2678_v27 = vpop.eup %2677 }
 0x123   :  { %v2680_v30 = vpop.eup %2679  ;;  %v287_v33 = vmul.f32 0.0, %v2678_v27 }
 0x124   :  { %v286_v36 = vmul.f32 0.0, %v2680_v30 }
 0x183   :  { %v293_v28 = vpop.permute.xlu0 %292 }
 0x184   :  { %v297_v29 = vmul.f32 %v2678_v27, %v293_v28 }
 0x186   :  { %302 = vrot.lane.b32.xlu1 %v297_v29, %s2969_s3 }
 0x187   :  { %v291_v31 = vpop.permute.xlu0 %290 }
 0x188   :  { %v296_v32 = vmul.f32 %v2680_v30, %v291_v31 }
 0x18a   :  { %300 = vrot.lane.b32.xlu1 %v296_v32, %s2969_s3 }
 0x1f8   :  { %v303_v34 = vpop.permute.xlu1 %302 }
 0x1f9   :  { %v3081_v35 = vadd.f32 %v303_v34, %v287_v33 }
 0x1fb   :  { %2681 = vtanh.f32 %v3081_v35 }
 0x1fc   :  { %v301_v37 = vpop.permute.xlu1 %300 }
 0x1fd   :  { %v3084_v38 = vadd.f32 %v301_v37, %v286_v36 }
 0x1ff   :  { %2683 = vtanh.f32 %v3084_v38  ;;  %v521_v32 = vrot.slane %v3084_v38, 7 }
 0x208   :  { %v2682_v43 = vpop.eup %2681 }
 0x209   :  { %314 = vrot.lane.b32.xlu0 %v2682_v43, %s2968_s21 }
 0x20c   :  { %v2684_v46 = vpop.eup %2683 }
 0x20d   :  { %312 = vrot.lane.b32.xlu1 %v2684_v46, %s2968_s21 }
 0x27b   :  { %v315_v49 = vpop.permute.xlu0 %314 }
 0x27c   :  { %v319_v50 = vmul.f32 %v2678_v27, %v315_v49 }
 0x27e   :  { %v322_v52 = vrot.slane %v319_v50, 7 }
 0x27f   :  { %v313_v51 = vpop.permute.xlu1 %312 }
 0x280   :  { %v318_v53 = vmul.f32 %v2680_v30, %v313_v51  ;;  %v522_v30 = vrot.slane %v3081_v35, 7 }
 0x282   :  { %v324_v54 = vsel %vm323_vm2, %v322_v52, %v318_v53 }
 0x283   :  { %325 = vrot.lane.b32.xlu0 %v324_v54, %s2969_s3 }
 0x2f5   :  { %v326_v55 = vpop.permute.xlu0 %325 }
 0x2f6   :  { %v328_v56 = vsel %vm192_vm3, %v326_v55, 0.0  ;;  %2457 = vmatmul.mubr.msk.f32.vlgmr.msra.gmra.mxu1 %vm192_vm3, %v326_v55 }
 0x2f7   :  { %2446 = vmatmul.mubr.msk.f32.vlgmr.msra.gmra.mxu0 %vm329_vm4, %v328_v56  ;;  %2460 = vmatpush3.msra.mxu1 %v3087_v39 }
 0x2f8   :  { %2461 = vmatprep.subr.mxu1 %v2966_v0  ;;  %2479 = vmatpush3.msra.mxu0 %v3038_v4 }
 0x2f9   :  { %2462 = vmatpush3.msra.mxu1 %v3089_v40  ;;  %2480 = vmatprep.subr.mxu0 %v2966_v0 }
 0x2fa   :  { %2463 = vmatprep.subr.mxu1 %v2966_v0  ;;  %2481 = vmatpush3.msra.mxu0 %v3041_v6 }
 0x2fb   :  { %2464 = vmatpush3.msra.mxu1 %v3093_v41  ;;  %2482 = vmatprep.subr.mxu0 %v2966_v0 }
 0x2fc   :  { %2465 = vmatprep.subr.mxu1 %v2966_v0  ;;  %2483 = vmatpush3.msra.mxu0 %v3050_v7 }
 0x2fd   :  { %2466 = vmatpush3.msra.mxu1 %v3097_v42  ;;  %2484 = vmatprep.subr.mxu0 %v2966_v0 }
 0x2fe   :  { %2467 = vmatprep.subr.mxu1 %v2966_v0  ;;  %2485 = vmatpush3.msra.mxu0 %v3056_v8 }
 0x2ff   :  { %2468 = vmatpush3.msra.mxu1 %v3102_v44  ;;  %2486 = vmatprep.mubr.msk.f32.mxu0 %vm2967_vm0, %v2966_v0 }
 0x300   :  { %2469 = vmatprep.subr.mxu1 %v2966_v0  ;;  %2475 = vmatprep.mubr.msk.f32.mxu1 %vm2967_vm0, %v2966_v0 }
 0x301   :  { %2470 = vmatpush3.msra.mxu1 %v3106_v45  ;;  %2489 = vmatprep.subr.mxu0 %v2966_v0 }
 0x302   :  { %2471 = vmatprep.subr.mxu1 %v2966_v0 }
 0x303   :  { %2472 = vmatpush3.msra.mxu1 %v3111_v47 }
 0x304   :  { %2473 = vmatprep.subr.mxu1 %v2966_v0 }
 0x305   :  { %2474 = vmatpush3.msra.mxu1 %v3117_v48 }
 0x306   :  { %2508 = vmatprep.subr.mxu1 %v2966_v0 }
 0x3b6   :  { %v495_v57 = vpop.f32.mrf.mxu1 }
 0x3b7   :  { %v500_v58 = vrot.slane %v495_v57, 7  ;;  %v504_v59 = vadd.f32 %v495_v57, %v3071_v13  ;;  %v399_v60 = vpop.f32.mrf.mxu0 }
 0x3b8   :  { %v2458_v61 = vpop.f32.mrf.mxu1  ;;  %v400_v2 = vadd.f32 %v3159_v63, %v399_v60 }
 0x3b9   :  { %v503_v62 = vadd.f32 %v500_v58, %v3074_v17  ;;  %2685 = vtanh.f32 %v504_v59  ;;  %v2447_v1 = vpop.f32.mrf.mxu0  ;;  %v2261_v10 = vmul.f32 -1.442695, %v504_v59 }
 0x3ba   :  { %v2258_v12 = vmul.f32 -1.442695, %v400_v2 }
 0x3bb   :  { %2687 = vtanh.f32 %v503_v62  ;;  %v2260_v11 = vmul.f32 -1.442695, %v503_v62 }
 0x3bc   :  { %2689 = vtanh.f32 %v400_v2 }
 0x3bd   :  { %2691 = vpow2.f32 %v2261_v10 }
 0x3be   :  { %2693 = vpow2.f32 %v2260_v11 }
 0x3bf   :  { %2695 = vpow2.f32 %v2258_v12 }
 0x3c6   :  { %v2686_v3 = vpop.eup %2685 }
 0x3c7   :  { %531 = vrot.lane.b32.xlu0 %v2686_v3, %s2968_s21 }
 0x3c8   :  { %v2688_v5 = vpop.eup %2687 }
 0x3c9   :  { %529 = vrot.lane.b32.xlu1 %v2688_v5, %s2968_s21  ;;  %v2690_v9 = vpop.eup %2689 }
 0x3ca   :  { %v2692_v14 = vpop.eup %2691 }
 0x3cb   :  { %v2694_v15 = vpop.eup %2693  ;;  %v512_v16 = vadd.f32 1.0, %v2692_v14 }
 0x3cc   :  { %v511_v18 = vadd.f32 1.0, %v2694_v15  ;;  %v2696_v19 = vpop.eup %2695 }
 0x3cd   :  { %412 = vrot.lane.b32.xlu1 %v2690_v9, %s2968_s21  ;;  %2697 = vrcp.f32 %v512_v16  ;;  %v406_v20 = vadd.f32 1.0, %v2696_v19 }
 0x3ce   :  { %2699 = vrcp.f32 %v511_v18 }
 0x3cf   :  { %2701 = vrcp.f32 %v406_v20 }
 0x3da   :  { %v2698_v21 = vpop.eup %2697 }
 0x3db   :  { %v2700_v24 = vpop.eup %2699  ;;  %v526_v31 = vmul.f32 %v2698_v21, %v522_v30 }
 0x3dc   :  { %v2702_v27 = vpop.eup %2701  ;;  %v525_v36 = vmul.f32 %v2700_v24, %v521_v32 }
 0x3dd   :  { %v410_v46 = vmul.f32 0.0, %v2702_v27 }
 0x439   :  { %v532_v22 = vpop.permute.xlu0 %531 }
 0x43a   :  { %v536_v23 = vmul.f32 %v2698_v21, %v532_v22 }
 0x43b   :  { %v530_v25 = vpop.permute.xlu1 %529 }
 0x43c   :  { %541 = vrot.lane.b32.xlu1 %v536_v23, %s2969_s3  ;;  %v535_v26 = vmul.f32 %v2700_v24, %v530_v25 }
 0x43e   :  { %539 = vrot.lane.b32.xlu0 %v535_v26, %s2969_s3 }
 0x43f   :  { %v413_v28 = vpop.permute.xlu1 %412 }
 0x440   :  { %v415_v29 = vmul.f32 %v2702_v27, %v413_v28 }
 0x442   :  { %417 = vrot.lane.b32.xlu0 %v415_v29, %s2969_s3 }
 0x4ae   :  { %v542_v33 = vpop.permute.xlu1 %541 }
 0x4af   :  { %v3170_v34 = vadd.f32 %v542_v33, %v526_v31 }
 0x4b0   :  { %v540_v37 = vpop.permute.xlu0 %539 }
 0x4b1   :  { %2703 = vtanh.f32 %v3170_v34  ;;  %v3173_v43 = vadd.f32 %v540_v37, %v525_v36 }
 0x4b3   :  { %2705 = vtanh.f32 %v3173_v43 }
 0x4b4   :  { %v418_v49 = vpop.permute.xlu0 %417 }
 0x4b5   :  { %v3176_v50 = vadd.f32 %v418_v49, %v410_v46 }
 0x4b7   :  { %2707 = vtanh.f32 %v3176_v50 }
 0x4be   :  { %v2704_v35 = vpop.eup %2703 }
 0x4bf   :  { %553 = vrot.lane.b32.xlu0 %v2704_v35, %s2968_s21 }
 0x4c0   :  { %v2706_v38 = vpop.eup %2705 }
 0x4c1   :  { %551 = vrot.lane.b32.xlu1 %v2706_v38, %s2968_s21 }
 0x4c4   :  { %v2708_v51 = vpop.eup %2707 }
 0x4c5   :  { %423 = vrot.lane.b32.xlu1 %v2708_v51, %s2968_s21 }
 0x531   :  { %v554_v52 = vpop.permute.xlu0 %553 }
 0x532   :  { %v558_v53 = vmul.f32 %v2698_v21, %v554_v52 }
 0x533   :  { %v552_v55 = vpop.permute.xlu1 %551 }
 0x534   :  { %v561_v54 = vrot.slane %v558_v53, 7  ;;  %v557_v56 = vmul.f32 %v2700_v24, %v552_v55 }
 0x536   :  { %v671_v57 = vrot.slane %v557_v56, 1  ;;  %v563_v58 = vsel %vm562_vm5, %v561_v54, %v557_v56  ;;  %v771_v54 = vrot.slane %v3170_v34, 7 }
 0x537   :  { %564 = vrot.lane.b32.xlu0 %v563_v58, %s2969_s3  ;;  %v424_v59 = vpop.permute.xlu1 %423 }
 0x538   :  { %v3183_v60 = vmul.f32 %v2702_v27, %v424_v59  ;;  %v672_v62 = vsel %vm323_vm2, %v558_v53, %v671_v57  ;;  %v770_v53 = vrot.slane %v3173_v43, 7 }
 0x53a   :  { %v568_v61 = vrot.slane %v3183_v60, 7 }
 0x53b   :  { %673 = vrot.lane.b32.xlu0 %v672_v62, %s2969_s3 }
 0x53c   :  { %569 = vrot.lane.b32.xlu1 %v568_v61, %s2968_s21 }
 0x5a9   :  { %v565_v1 = vpop.permute.xlu0 %564 }
 0x5ad   :  { %v674_v2 = vpop.permute.xlu0 %673 }
 0x5ae   :  { %2487 = vmatmul.mubr.msk.f32.vlgmr.msra.gmra.mxu0 %vm192_vm3, %v674_v2  ;;  %v570_v3 = vpop.permute.xlu1 %569 }
 0x5af   :  { %v572_v5 = vsel %vm192_vm3, %v565_v1, %v570_v3  ;;  %2490 = vmatpush3.msra.mxu0 %v3087_v39  ;;  %2505 = vmatprep.mubr.msk.f32.mxu0 %vm2967_vm0, %v2966_v0 }
 0x5b0   :  { %v574_v9 = vrot.slane %v572_v5, 1  ;;  %2491 = vmatprep.subr.mxu0 %v2966_v0 }
 0x5b1   :  { %2492 = vmatpush3.msra.mxu0 %v3089_v40 }
 0x5b2   :  { %2476 = vmatmul.mubr.msk.f32.vlgmr.msra.gmra.mxu1 %vm329_vm4, %v574_v9  ;;  %2493 = vmatprep.subr.mxu0 %v2966_v0 }
 0x5b3   :  { %2494 = vmatpush3.msra.mxu0 %v3093_v41  ;;  %2509 = vmatpush3.msra.mxu1 %v3038_v4 }
 0x5b4   :  { %2495 = vmatprep.subr.mxu0 %v2966_v0  ;;  %2510 = vmatprep.subr.mxu1 %v2966_v0 }
 0x5b5   :  { %2496 = vmatpush3.msra.mxu0 %v3097_v42  ;;  %2511 = vmatpush3.msra.mxu1 %v3041_v6 }
 0x5b6   :  { %2497 = vmatprep.subr.mxu0 %v2966_v0  ;;  %2512 = vmatprep.subr.mxu1 %v2966_v0 }
 0x5b7   :  { %2498 = vmatpush3.msra.mxu0 %v3102_v44  ;;  %2513 = vmatpush3.msra.mxu1 %v3050_v7 }
 0x5b8   :  { %2499 = vmatprep.subr.mxu0 %v2966_v0  ;;  %2514 = vmatprep.subr.mxu1 %v2966_v0 }
 0x5b9   :  { %2500 = vmatpush3.msra.mxu0 %v3106_v45  ;;  %2515 = vmatpush3.msra.mxu1 %v3056_v8 }
 0x5ba   :  { %2501 = vmatprep.subr.mxu0 %v2966_v0  ;;  %2516 = vmatprep.mubr.msk.f32.mxu1 %vm2967_vm0, %v2966_v0 }
 0x5bb   :  { %2502 = vmatpush3.msra.mxu0 %v3111_v47  ;;  %2519 = vmatprep.subr.mxu1 %v2966_v0 }
 0x5bc   :  { %2503 = vmatprep.subr.mxu0 %v2966_v0 }
 0x5bd   :  { %2504 = vmatpush3.msra.mxu0 %v3117_v48 }
 0x5be   :  { %2538 = vmatprep.subr.mxu0 %v2966_v0 }
 0x66e   :  { %v743_v10 = vpop.f32.mrf.mxu0 }
 0x66f   :  { %v748_v11 = vrot.slane %v743_v10, 6  ;;  %v749_v12 = vrot.slane %v743_v10, 7 }
 0x670   :  { %v2488_v14 = vpop.f32.mrf.mxu0 }
 0x671   :  { %v752_v15 = vadd.f32 %v748_v11, %v3074_v17  ;;  %v753_v16 = vadd.f32 %v749_v12, %v3071_v13 }
 0x672   :  { %v643_v18 = vpop.f32.mrf.mxu1 }
 0x673   :  { %2709 = vtanh.f32 %v752_v15  ;;  %v644_v19 = vadd.f32 %v3159_v63, %v643_v18  ;;  %v2265_v24 = vmul.f32 -1.442695, %v752_v15  ;;  %v2266_v25 = vmul.f32 -1.442695, %v753_v16 }
 0x674   :  { %2711 = vtanh.f32 %v753_v16  ;;  %v2477_v20 = vpop.f32.mrf.mxu1 }
 0x675   :  { %2713 = vtanh.f32 %v644_v19  ;;  %v2263_v26 = vmul.f32 -1.442695, %v644_v19 }
 0x676   :  { %2715 = vpow2.f32 %v2265_v24 }
 0x677   :  { %2717 = vpow2.f32 %v2266_v25 }
 0x678   :  { %2719 = vpow2.f32 %v2263_v26 }
 0x680   :  { %v2710_v21 = vpop.eup %2709 }
 0x681   :  { %v2712_v22 = vpop.eup %2711  ;;  %778 = vrot.lane.b32.xlu1 %v2710_v21, %s2968_s21 }
 0x682   :  { %780 = vrot.lane.b32.xlu0 %v2712_v22, %s2968_s21  ;;  %v2714_v23 = vpop.eup %2713 }
 0x683   :  { %v2716_v27 = vpop.eup %2715 }
 0x684   :  { %v2718_v28 = vpop.eup %2717  ;;  %v760_v29 = vadd.f32 1.0, %v2716_v27 }
 0x685   :  { %656 = vrot.lane.b32.xlu1 %v2714_v23, %s2968_s21  ;;  %v761_v30 = vadd.f32 1.0, %v2718_v28  ;;  %v2720_v31 = vpop.eup %2719 }
 0x686   :  { %2721 = vrcp.f32 %v760_v29  ;;  %v650_v32 = vadd.f32 1.0, %v2720_v31 }
 0x687   :  { %2723 = vrcp.f32 %v761_v30 }
 0x688   :  { %2725 = vrcp.f32 %v650_v32 }
 0x693   :  { %v2722_v33 = vpop.eup %2721 }
 0x694   :  { %v2724_v37 = vpop.eup %2723  ;;  %v774_v55 = vmul.f32 %v2722_v33, %v770_v53 }
 0x695   :  { %v2726_v38 = vpop.eup %2725  ;;  %v775_v56 = vmul.f32 %v2724_v37, %v771_v54 }
 0x696   :  { %v654_v62 = vmul.f32 %v2726_v38, %v3176_v50 }
 0x6f3   :  { %v779_v36 = vpop.permute.xlu1 %778 }
 0x6f4   :  { %v781_v46 = vpop.permute.xlu0 %780  ;;  %v784_v49 = vmul.f32 %v2722_v33, %v779_v36 }
 0x6f5   :  { %v785_v35 = vmul.f32 %v2724_v37, %v781_v46 }
 0x6f6   :  { %788 = vrot.lane.b32.xlu0 %v784_v49, %s2969_s3 }
 0x6f7   :  { %790 = vrot.lane.b32.xlu1 %v785_v35, %s2969_s3  ;;  %v657_v51 = vpop.permute.xlu1 %656 }
 0x6f8   :  { %v659_v52 = vmul.f32 %v2726_v38, %v657_v51 }
 0x6fa   :  { %661 = vrot.lane.b32.xlu0 %v659_v52, %s2969_s3 }
 0x768   :  { %v789_v57 = vpop.permute.xlu0 %788 }
 0x769   :  { %v791_v58 = vpop.permute.xlu1 %790  ;;  %v3231_v59 = vadd.f32 %v789_v57, %v774_v55 }
 0x76a   :  { %v3233_v61 = vadd.f32 %v791_v58, %v775_v56 }
 0x76b   :  { %2727 = vtanh.f32 %v3231_v59 }
 0x76c   :  { %2729 = vtanh.f32 %v3233_v61  ;;  %v662_v1 = vpop.permute.xlu0 %661 }
 0x76d   :  { %v3238_v2 = vadd.f32 %v662_v1, %v654_v62 }
 0x76f   :  { %2731 = vtanh.f32 %v3238_v2 }
 0x778   :  { %v2728_v34 = vpop.eup %2727 }
 0x779   :  { %v2730_v43 = vpop.eup %2729  ;;  %800 = vrot.lane.b32.xlu1 %v2728_v34, %s2968_s21 }
 0x77a   :  { %802 = vrot.lane.b32.xlu0 %v2730_v43, %s2968_s21 }
 0x77c   :  { %v2732_v3 = vpop.eup %2731 }
 0x77d   :  { %667 = vrot.lane.b32.xlu1 %v2732_v3, %s2968_s21 }
 0x7eb   :  { %v801_v5 = vpop.permute.xlu1 %800 }
 0x7ec   :  { %v803_v9 = vpop.permute.xlu0 %802  ;;  %v806_v11 = vmul.f32 %v2722_v33, %v801_v5 }
 0x7ed   :  { %v807_v10 = vmul.f32 %v2724_v37, %v803_v9 }
 0x7ee   :  { %v920_v15 = vrot.slane %v806_v11, 2 }
 0x7ef   :  { %v810_v50 = vrot.slane %v807_v10, 7  ;;  %v668_v12 = vpop.permute.xlu1 %667  ;;  %v921_v14 = vrot.slane %v807_v10, 1 }
 0x7f0   :  { %v3244_v16 = vmul.f32 %v2726_v38, %v668_v12 }
 0x7f1   :  { %v812_v18 = vsel %vm811_vm6, %v810_v50, %v806_v11  ;;  %v922_v20 = vsel %vm323_vm2, %v921_v14, %v920_v15  ;;  %v1020_v11 = vrot.slane %v3231_v59, 7  ;;  %v1021_v50 = vrot.slane %v3233_v61, 7 }
 0x7f2   :  { %813 = vrot.lane.b32.xlu0 %v812_v18, %s2969_s3  ;;  %v817_v19 = vrot.slane %v3244_v16, 6 }
 0x7f4   :  { %818 = vrot.lane.b32.xlu1 %v817_v19, %s2968_s21 }
 0x7f6   :  { %923 = vrot.lane.b32.xlu0 %v922_v20, %s2969_s3 }
 0x864   :  { %v814_v21 = vpop.permute.xlu0 %813 }
 0x866   :  { %v819_v22 = vpop.permute.xlu1 %818 }
 0x867   :  { %v821_v23 = vsel %vm192_vm3, %v814_v21, %v819_v22 }
 0x868   :  { %v924_v24 = vpop.permute.xlu0 %923  ;;  %v823_v25 = vrot.slane %v821_v23, 2 }
 0x869   :  { %2517 = vmatmul.mubr.msk.f32.vlgmr.msra.gmra.mxu1 %vm192_vm3, %v924_v24 }
 0x86a   :  { %2520 = vmatpush3.msra.mxu1 %v3087_v39  ;;  %2535 = vmatprep.mubr.msk.f32.mxu1 %vm2967_vm0, %v2966_v0 }
 0x86b   :  { %2506 = vmatmul.mubr.msk.f32.vlgmr.msra.gmra.mxu0 %vm329_vm4, %v823_v25  ;;  %2521 = vmatprep.subr.mxu1 %v2966_v0 }
 0x86c   :  { %2522 = vmatpush3.msra.mxu1 %v3089_v40  ;;  %2539 = vmatpush3.msra.mxu0 %v3038_v4 }
 0x86d   :  { %2523 = vmatprep.subr.mxu1 %v2966_v0  ;;  %2540 = vmatprep.subr.mxu0 %v2966_v0 }
 0x86e   :  { %2524 = vmatpush3.msra.mxu1 %v3093_v41  ;;  %2541 = vmatpush3.msra.mxu0 %v3041_v6 }
 0x86f   :  { %2525 = vmatprep.subr.mxu1 %v2966_v0  ;;  %2542 = vmatprep.subr.mxu0 %v2966_v0 }
 0x870   :  { %2526 = vmatpush3.msra.mxu1 %v3097_v42  ;;  %2543 = vmatpush3.msra.mxu0 %v3050_v7 }
 0x871   :  { %2527 = vmatprep.subr.mxu1 %v2966_v0  ;;  %2544 = vmatprep.subr.mxu0 %v2966_v0 }
 0x872   :  { %2528 = vmatpush3.msra.mxu1 %v3102_v44  ;;  %2545 = vmatpush3.msra.mxu0 %v3056_v8 }
 0x873   :  { %2529 = vmatprep.subr.mxu1 %v2966_v0  ;;  %2546 = vmatprep.mubr.msk.f32.mxu0 %vm2967_vm0, %v2966_v0 }
 0x874   :  { %2530 = vmatpush3.msra.mxu1 %v3106_v45  ;;  %2549 = vmatprep.subr.mxu0 %v2966_v0 }
 0x875   :  { %2531 = vmatprep.subr.mxu1 %v2966_v0 }
 0x876   :  { %2532 = vmatpush3.msra.mxu1 %v3111_v47 }
 0x877   :  { %2533 = vmatprep.subr.mxu1 %v2966_v0 }
 0x878   :  { %2534 = vmatpush3.msra.mxu1 %v3117_v48 }
 0x879   :  { %2568 = vmatprep.subr.mxu1 %v2966_v0 }
 0x929   :  { %v993_v26 = vpop.f32.mrf.mxu1 }
 0x92a   :  { %v998_v27 = vrot.slane %v993_v26, 5  ;;  %v999_v28 = vrot.slane %v993_v26, 6 }
 0x92b   :  { %v892_v29 = vpop.f32.mrf.mxu0  ;;  %v2518_v30 = vpop.f32.mrf.mxu1 }
 0x92c   :  { %v1002_v31 = vadd.f32 %v998_v27, %v3074_v17  ;;  %v1003_v32 = vadd.f32 %v999_v28, %v3071_v13  ;;  %v893_v36 = vadd.f32 %v3159_v63, %v892_v29 }
 0x92d   :  { %v2507_v33 = vpop.f32.mrf.mxu0 }
 0x92e   :  { %2733 = vtanh.f32 %v1002_v31  ;;  %v2270_v35 = vmul.f32 -1.442695, %v1002_v31  ;;  %v2271_v38 = vmul.f32 -1.442695, %v1003_v32  ;;  %v2268_v51 = vmul.f32 -1.442695, %v893_v36 }
 0x92f   :  { %2735 = vtanh.f32 %v1003_v32 }
 0x930   :  { %2737 = vtanh.f32 %v893_v36 }
 0x931   :  { %2739 = vpow2.f32 %v2270_v35 }
 0x932   :  { %2741 = vpow2.f32 %v2271_v38 }
 0x933   :  { %2743 = vpow2.f32 %v2268_v51 }
 0x93b   :  { %v2734_v37 = vpop.eup %2733 }
 0x93c   :  { %v2736_v46 = vpop.eup %2735  ;;  %1028 = vrot.lane.b32.xlu1 %v2734_v37, %s2968_s21 }
 0x93d   :  { %1030 = vrot.lane.b32.xlu0 %v2736_v46, %s2968_s21  ;;  %v2738_v49 = vpop.eup %2737 }
 0x93e   :  { %v2740_v52 = vpop.eup %2739 }
 0x93f   :  { %v2742_v53 = vpop.eup %2741  ;;  %v1010_v54 = vadd.f32 1.0, %v2740_v52 }
 0x940   :  { %905 = vrot.lane.b32.xlu1 %v2738_v49, %s2968_s21  ;;  %v1011_v55 = vadd.f32 1.0, %v2742_v53  ;;  %v2744_v56 = vpop.eup %2743 }
 0x941   :  { %2745 = vrcp.f32 %v1010_v54  ;;  %v899_v57 = vadd.f32 1.0, %v2744_v56 }
 0x942   :  { %2747 = vrcp.f32 %v1011_v55 }
 0x943   :  { %2749 = vrcp.f32 %v899_v57 }
 0x94e   :  { %v2746_v58 = vpop.eup %2745 }
 0x94f   :  { %v2748_v1 = vpop.eup %2747  ;;  %v1024_v12 = vmul.f32 %v2746_v58, %v1020_v11 }
 0x950   :  { %v2750_v5 = vpop.eup %2749  ;;  %v1025_v15 = vmul.f32 %v2748_v1, %v1021_v50 }
 0x951   :  { %v903_v21 = vmul.f32 %v2750_v5, %v3238_v2 }
 0x9ae   :  { %v1029_v62 = vpop.permute.xlu1 %1028 }
 0x9af   :  { %v1031_v34 = vpop.permute.xlu0 %1030  ;;  %v1034_v43 = vmul.f32 %v2746_v58, %v1029_v62 }
 0x9b0   :  { %v1035_v3 = vmul.f32 %v2748_v1, %v1031_v34 }
 0x9b1   :  { %1038 = vrot.lane.b32.xlu0 %v1034_v43, %s2969_s3 }
 0x9b2   :  { %1040 = vrot.lane.b32.xlu1 %v1035_v3, %s2969_s3  ;;  %v906_v9 = vpop.permute.xlu1 %905 }
 0x9b3   :  { %v908_v10 = vmul.f32 %v2750_v5, %v906_v9 }
 0x9b5   :  { %910 = vrot.lane.b32.xlu0 %v908_v10, %s2969_s3 }
 0xa23   :  { %v1039_v14 = vpop.permute.xlu0 %1038 }
 0xa24   :  { %v3293_v18 = vadd.f32 %v1039_v14, %v1024_v12  ;;  %v1041_v19 = vpop.permute.xlu1 %1040 }
 0xa25   :  { %v3295_v20 = vadd.f32 %v1041_v19, %v1025_v15 }
 0xa26   :  { %2751 = vtanh.f32 %v3293_v18 }
 0xa27   :  { %2753 = vtanh.f32 %v3295_v20  ;;  %v911_v22 = vpop.permute.xlu0 %910 }
 0xa28   :  { %v3300_v23 = vadd.f32 %v911_v22, %v903_v21 }
 0xa2a   :  { %2755 = vtanh.f32 %v3300_v23 }
 0xa33   :  { %v2752_v59 = vpop.eup %2751 }
 0xa34   :  { %v2754_v61 = vpop.eup %2753  ;;  %1050 = vrot.lane.b32.xlu1 %v2752_v59, %s2968_s21 }
 0xa35   :  { %1052 = vrot.lane.b32.xlu0 %v2754_v61, %s2968_s21 }
 0xa37   :  { %v2756_v24 = vpop.eup %2755 }
 0xa38   :  { %916 = vrot.lane.b32.xlu1 %v2756_v24, %s2968_s21 }
 0xaa6   :  { %v1051_v25 = vpop.permute.xlu1 %1050 }
 0xaa7   :  { %v1053_v26 = vpop.permute.xlu0 %1052  ;;  %v1056_v27 = vmul.f32 %v2746_v58, %v1051_v25  ;;  %v1270_v25 = vrot.slane %v3293_v18, 7 }
 0xaa8   :  { %v1057_v28 = vmul.f32 %v2748_v1, %v1053_v26  ;;  %v1271_v26 = vrot.slane %v3295_v20, 7 }
 0xaa9   :  { %v1170_v30 = vrot.slane %v1056_v27, 3 }
 0xaaa   :  { %v1060_v2 = vrot.slane %v1057_v28, 7  ;;  %v917_v29 = vpop.permute.xlu1 %916  ;;  %v1171_v31 = vrot.slane %v1057_v28, 2 }
 0xaab   :  { %v3306_v32 = vmul.f32 %v2750_v5, %v917_v29 }
 0xaac   :  { %v1062_v33 = vsel %vm1061_vm7, %v1060_v2, %v1056_v27  ;;  %v1172_v37 = vsel %vm323_vm2, %v1171_v31, %v1170_v30 }
 0xaad   :  { %1063 = vrot.lane.b32.xlu0 %v1062_v33, %s2969_s3  ;;  %v1067_v36 = vrot.slane %v3306_v32, 5 }
 0xaaf   :  { %1068 = vrot.lane.b32.xlu1 %v1067_v36, %s2968_s21 }
 0xab1   :  { %1173 = vrot.lane.b32.xlu0 %v1172_v37, %s2969_s3 }
 0xb1f   :  { %v1064_v46 = vpop.permute.xlu0 %1063 }
 0xb21   :  { %v1069_v49 = vpop.permute.xlu1 %1068 }
 0xb22   :  { %v1071_v35 = vsel %vm192_vm3, %v1064_v46, %v1069_v49 }
 0xb23   :  { %v1174_v38 = vpop.permute.xlu0 %1173  ;;  %v1073_v51 = vrot.slane %v1071_v35, 3 }
 0xb24   :  { %2547 = vmatmul.mubr.msk.f32.vlgmr.msra.gmra.mxu0 %vm192_vm3, %v1174_v38 }
 0xb25   :  { %2550 = vmatpush3.msra.mxu0 %v3087_v39  ;;  %2565 = vmatprep.mubr.msk.f32.mxu0 %vm2967_vm0, %v2966_v0 }
 0xb26   :  { %2536 = vmatmul.mubr.msk.f32.vlgmr.msra.gmra.mxu1 %vm329_vm4, %v1073_v51  ;;  %2551 = vmatprep.subr.mxu0 %v2966_v0 }
 0xb27   :  { %2552 = vmatpush3.msra.mxu0 %v3089_v40  ;;  %2569 = vmatpush3.msra.mxu1 %v3038_v4 }
 0xb28   :  { %2553 = vmatprep.subr.mxu0 %v2966_v0  ;;  %2570 = vmatprep.subr.mxu1 %v2966_v0 }
 0xb29   :  { %2554 = vmatpush3.msra.mxu0 %v3093_v41  ;;  %2571 = vmatpush3.msra.mxu1 %v3041_v6 }
 0xb2a   :  { %2555 = vmatprep.subr.mxu0 %v2966_v0  ;;  %2572 = vmatprep.subr.mxu1 %v2966_v0 }
 0xb2b   :  { %2556 = vmatpush3.msra.mxu0 %v3097_v42  ;;  %2573 = vmatpush3.msra.mxu1 %v3050_v7 }
 0xb2c   :  { %2557 = vmatprep.subr.mxu0 %v2966_v0  ;;  %2574 = vmatprep.subr.mxu1 %v2966_v0 }
 0xb2d   :  { %2558 = vmatpush3.msra.mxu0 %v3102_v44  ;;  %2575 = vmatpush3.msra.mxu1 %v3056_v8 }
 0xb2e   :  { %2559 = vmatprep.subr.mxu0 %v2966_v0  ;;  %2576 = vmatprep.mubr.msk.f32.mxu1 %vm2967_vm0, %v2966_v0 }
 0xb2f   :  { %2560 = vmatpush3.msra.mxu0 %v3106_v45  ;;  %2579 = vmatprep.subr.mxu1 %v2966_v0 }
 0xb30   :  { %2561 = vmatprep.subr.mxu0 %v2966_v0 }
 0xb31   :  { %2562 = vmatpush3.msra.mxu0 %v3111_v47 }
 0xb32   :  { %2563 = vmatprep.subr.mxu0 %v2966_v0 }
 0xb33   :  { %2564 = vmatpush3.msra.mxu0 %v3117_v48 }
 0xb34   :  { %2598 = vmatprep.subr.mxu0 %v2966_v0 }
 0xbe4   :  { %v1243_v4 = vpop.f32.mrf.mxu0 }
 0xbe5   :  { %v1248_v6 = vrot.slane %v1243_v4, 4  ;;  %v1249_v7 = vrot.slane %v1243_v4, 5 }
 0xbe6   :  { %v1142_v8 = vpop.f32.mrf.mxu1  ;;  %v2548_v52 = vpop.f32.mrf.mxu0 }
 0xbe7   :  { %v1252_v53 = vadd.f32 %v1248_v6, %v3074_v17  ;;  %v1253_v54 = vadd.f32 %v1249_v7, %v3071_v13  ;;  %v1143_v56 = vadd.f32 %v3159_v63, %v1142_v8 }
 0xbe8   :  { %v2537_v55 = vpop.f32.mrf.mxu1 }
 0xbe9   :  { %2757 = vtanh.f32 %v1252_v53  ;;  %v2275_v1 = vmul.f32 -1.442695, %v1252_v53  ;;  %v2276_v34 = vmul.f32 -1.442695, %v1253_v54  ;;  %v2273_v43 = vmul.f32 -1.442695, %v1143_v56 }
 0xbea   :  { %2759 = vtanh.f32 %v1253_v54 }
 0xbeb   :  { %2761 = vtanh.f32 %v1143_v56 }
 0xbec   :  { %2763 = vpow2.f32 %v2275_v1  ;;  %v3383_v1 = vld [vmem:[#allocation6 + $0x18] sm:$0xff] }
 0xbed   :  { %2765 = vpow2.f32 %v2276_v34 }
 0xbee   :  { %2767 = vpow2.f32 %v2273_v43 }
 0xbf6   :  { %v2758_v57 = vpop.eup %2757 }
 0xbf7   :  { %v2760_v58 = vpop.eup %2759  ;;  %1278 = vrot.lane.b32.xlu1 %v2758_v57, %s2968_s21 }
 0xbf8   :  { %1280 = vrot.lane.b32.xlu0 %v2760_v58, %s2968_s21  ;;  %v2762_v62 = vpop.eup %2761 }
 0xbf9   :  { %v2764_v3 = vpop.eup %2763 }
 0xbfa   :  { %v2766_v5 = vpop.eup %2765  ;;  %v1260_v9 = vadd.f32 1.0, %v2764_v3 }
 0xbfb   :  { %1155 = vrot.lane.b32.xlu1 %v2762_v62, %s2968_s21  ;;  %v1261_v10 = vadd.f32 1.0, %v2766_v5  ;;  %v2768_v11 = vpop.eup %2767 }
 0xbfc   :  { %2769 = vrcp.f32 %v1260_v9  ;;  %v1149_v50 = vadd.f32 1.0, %v2768_v11 }
 0xbfd   :  { %2771 = vrcp.f32 %v1261_v10 }
 0xbfe   :  { %2773 = vrcp.f32 %v1149_v50 }
 0xc09   :  { %v2770_v12 = vpop.eup %2769 }
 0xc0a   :  { %v2772_v15 = vpop.eup %2771  ;;  %v1274_v27 = vmul.f32 %v2770_v12, %v1270_v25 }
 0xc0b   :  { %v2774_v59 = vpop.eup %2773  ;;  %v1275_v28 = vmul.f32 %v2772_v15, %v1271_v26 }
 0xc0c   :  { %v1153_v33 = vmul.f32 %v2774_v59, %v3300_v23 }
 0xc69   :  { %v1279_v14 = vpop.permute.xlu1 %1278 }
 0xc6a   :  { %v1281_v19 = vpop.permute.xlu0 %1280  ;;  %v1284_v21 = vmul.f32 %v2770_v12, %v1279_v14 }
 0xc6b   :  { %v1285_v22 = vmul.f32 %v2772_v15, %v1281_v19 }
 0xc6c   :  { %1288 = vrot.lane.b32.xlu0 %v1284_v21, %s2969_s3 }
 0xc6d   :  { %1290 = vrot.lane.b32.xlu1 %v1285_v22, %s2969_s3  ;;  %v1156_v61 = vpop.permute.xlu1 %1155 }
 0xc6e   :  { %v1158_v24 = vmul.f32 %v2774_v59, %v1156_v61 }
 0xc70   :  { %1160 = vrot.lane.b32.xlu0 %v1158_v24, %s2969_s3 }
 0xcde   :  { %v1289_v2 = vpop.permute.xlu0 %1288 }
 0xcdf   :  { %v1291_v29 = vpop.permute.xlu1 %1290  ;;  %v3355_v30 = vadd.f32 %v1289_v2, %v1274_v27 }
 0xce0   :  { %v3357_v31 = vadd.f32 %v1291_v29, %v1275_v28 }
 0xce1   :  { %2775 = vtanh.f32 %v3355_v30 }
 0xce2   :  { %2777 = vtanh.f32 %v3357_v31  ;;  %v1161_v36 = vpop.permute.xlu0 %1160 }
 0xce3   :  { %v3362_v37 = vadd.f32 %v1161_v36, %v1153_v33  ;;  %v1520_v36 = vrot.slane %v3355_v30, 7 }
 0xce5   :  { %2779 = vtanh.f32 %v3362_v37 }
 0xcee   :  { %v2776_v18 = vpop.eup %2775 }
 0xcef   :  { %v2778_v20 = vpop.eup %2777  ;;  %1300 = vrot.lane.b32.xlu1 %v2776_v18, %s2968_s21  ;;  %v1521_v18 = vrot.slane %v3357_v31, 7 }
 0xcf0   :  { %1302 = vrot.lane.b32.xlu0 %v2778_v20, %s2968_s21 }
 0xcf2   :  { %v2780_v46 = vpop.eup %2779 }
 0xcf3   :  { %1166 = vrot.lane.b32.xlu1 %v2780_v46, %s2968_s21 }
 0xd61   :  { %v1301_v49 = vpop.permute.xlu1 %1300 }
 0xd62   :  { %v1303_v35 = vpop.permute.xlu0 %1302  ;;  %v1306_v51 = vmul.f32 %v2770_v12, %v1301_v49 }
 0xd63   :  { %v1307_v38 = vmul.f32 %v2772_v15, %v1303_v35 }
 0xd64   :  { %v1420_v7 = vrot.slane %v1306_v51, 4 }
 0xd65   :  { %v1310_v23 = vrot.slane %v1307_v38, 7  ;;  %v1167_v4 = vpop.permute.xlu1 %1166  ;;  %v1421_v6 = vrot.slane %v1307_v38, 3 }
 0xd66   :  { %v3368_v8 = vmul.f32 %v2774_v59, %v1167_v4 }
 0xd67   :  { %v1312_v52 = vsel %vm1311_vm8, %v1310_v23, %v1306_v51  ;;  %v1422_v54 = vsel %vm323_vm2, %v1421_v6, %v1420_v7 }
 0xd68   :  { %1313 = vrot.lane.b32.xlu0 %v1312_v52, %s2969_s3  ;;  %v1317_v53 = vrot.slane %v3368_v8, 4 }
 0xd6a   :  { %1318 = vrot.lane.b32.xlu1 %v1317_v53, %s2968_s21 }
 0xd6c   :  { %1423 = vrot.lane.b32.xlu0 %v1422_v54, %s2969_s3 }
 0xdda   :  { %v1314_v55 = vpop.permute.xlu0 %1313 }
 0xddc   :  { %v1319_v56 = vpop.permute.xlu1 %1318 }
 0xddd   :  { %v1321_v57 = vsel %vm192_vm3, %v1314_v55, %v1319_v56 }
 0xdde   :  { %v1424_v58 = vpop.permute.xlu0 %1423  ;;  %v1323_v62 = vrot.slane %v1321_v57, 4 }
 0xddf   :  { %2577 = vmatmul.mubr.msk.f32.vlgmr.msra.gmra.mxu1 %vm192_vm3, %v1424_v58 }
 0xde0   :  { %2580 = vmatpush3.msra.mxu1 %v3087_v39  ;;  %2595 = vmatprep.mubr.msk.f32.mxu1 %vm2967_vm0, %v2966_v0  ;;  %v3389_v39 = vld [vmem:[#allocation6 + $0x10] sm:$0xff] }
 0xde1   :  { %2566 = vmatmul.mubr.msk.f32.vlgmr.msra.gmra.mxu0 %vm329_vm4, %v1323_v62  ;;  %2581 = vmatprep.subr.mxu1 %v2966_v0 }
 0xde2   :  { %2582 = vmatpush3.msra.mxu1 %v3089_v40  ;;  %2599 = vmatpush3.msra.mxu0 %v3383_v1  ;;  %v3395_v40 = vld [vmem:[#allocation6 + $0x8] sm:$0xff] }
 0xde3   :  { %2583 = vmatprep.subr.mxu1 %v2966_v0  ;;  %2600 = vmatprep.subr.mxu0 %v2966_v0 }
 0xde4   :  { %2584 = vmatpush3.msra.mxu1 %v3093_v41  ;;  %2601 = vmatpush3.msra.mxu0 %v3389_v39  ;;  %v3401_v41 = vld [vmem:[#allocation6] sm:$0xff] }
 0xde5   :  { %2585 = vmatprep.subr.mxu1 %v2966_v0  ;;  %2602 = vmatprep.subr.mxu0 %v2966_v0 }
 0xde6   :  { %2586 = vmatpush3.msra.mxu1 %v3097_v42  ;;  %2603 = vmatpush3.msra.mxu0 %v3395_v40 }
 0xde7   :  { %2587 = vmatprep.subr.mxu1 %v2966_v0  ;;  %2604 = vmatprep.subr.mxu0 %v2966_v0 }
 0xde8   :  { %2588 = vmatpush3.msra.mxu1 %v3102_v44  ;;  %2605 = vmatpush3.msra.mxu0 %v3401_v41 }
 0xde9   :  { %2589 = vmatprep.subr.mxu1 %v2966_v0  ;;  %2606 = vmatprep.mubr.msk.f32.mxu0 %vm2967_vm0, %v2966_v0 }
 0xdea   :  { %2590 = vmatpush3.msra.mxu1 %v3106_v45  ;;  %2609 = vmatprep.subr.mxu0 %v2966_v0 }
 0xdeb   :  { %2591 = vmatprep.subr.mxu1 %v2966_v0 }
 0xdec   :  { %2592 = vmatpush3.msra.mxu1 %v3111_v47 }
 0xded   :  { %2593 = vmatprep.subr.mxu1 %v2966_v0 }
 0xdee   :  { %2594 = vmatpush3.msra.mxu1 %v3117_v48 }
 0xdef   :  { %2628 = vmatprep.subr.mxu1 %v2966_v0 }
 0xe9f   :  { %v1493_v42 = vpop.f32.mrf.mxu1 }
 0xea0   :  { %v1498_v44 = vrot.slane %v1493_v42, 3  ;;  %v1499_v34 = vrot.slane %v1493_v42, 4 }
 0xea1   :  { %v1392_v43 = vpop.f32.mrf.mxu0  ;;  %v2578_v3 = vpop.f32.mrf.mxu1 }
 0xea2   :  { %v1502_v5 = vadd.f32 %v1498_v44, %v3074_v17  ;;  %v1503_v45 = vadd.f32 %v1499_v34, %v3071_v13  ;;  %v1393_v47 = vadd.f32 %v3159_v63, %v1392_v43 }
 0xea3   :  { %v2567_v9 = vpop.f32.mrf.mxu0 }
 0xea4   :  { %2781 = vtanh.f32 %v1502_v5  ;;  %v2280_v50 = vmul.f32 -1.442695, %v1502_v5  ;;  %v2281_v12 = vmul.f32 -1.442695, %v1503_v45  ;;  %v2278_v14 = vmul.f32 -1.442695, %v1393_v47 }
 0xea5   :  { %2783 = vtanh.f32 %v1503_v45 }
 0xea6   :  { %2785 = vtanh.f32 %v1393_v47  ;;  %v3447_v47 = vld [vmem:[#allocation7 + $0x38] sm:$0xff] }
 0xea7   :  { %2787 = vpow2.f32 %v2280_v50 }
 0xea8   :  { %2789 = vpow2.f32 %v2281_v12 }
 0xea9   :  { %2791 = vpow2.f32 %v2278_v14 }
 0xeb1   :  { %v2782_v10 = vpop.eup %2781 }
 0xeb2   :  { %v2784_v11 = vpop.eup %2783  ;;  %1528 = vrot.lane.b32.xlu1 %v2782_v10, %s2968_s21  ;;  %v3454_v10 = vld [vmem:[#allocation7 + $0x30] sm:$0xff] }
 0xeb3   :  { %1530 = vrot.lane.b32.xlu0 %v2784_v11, %s2968_s21  ;;  %v2786_v48 = vpop.eup %2785  ;;  %v3460_v11 = vld [vmem:[#allocation7 + $0x28] sm:$0xff] }
 0xeb4   :  { %v2788_v15 = vpop.eup %2787 }
 0xeb5   :  { %v2790_v19 = vpop.eup %2789  ;;  %v1510_v21 = vadd.f32 1.0, %v2788_v15 }
 0xeb6   :  { %1405 = vrot.lane.b32.xlu1 %v2786_v48, %s2968_s21  ;;  %v1511_v63 = vadd.f32 1.0, %v2790_v19  ;;  %v2792_v22 = vpop.eup %2791  ;;  %v3466_v48 = vld [vmem:[#allocation7 + $0x20] sm:$0xff] }
 0xeb7   :  { %2793 = vrcp.f32 %v1510_v21  ;;  %v1399_v59 = vadd.f32 1.0, %v2792_v22 }
 0xeb8   :  { %2795 = vrcp.f32 %v1511_v63 }
 0xeb9   :  { %2797 = vrcp.f32 %v1399_v59  ;;  %v3496_v59 = vld [vmem:[%s3624_s5] ss:$0 sm:$0xff]  ;;  %s2970_s5 = smov 96  }
 0xec4   :  { %v2794_v61 = vpop.eup %2793 }
 0xec5   :  { %v2796_v25 = vpop.eup %2795  ;;  %v1524_v20 = vmul.f32 %v2794_v61, %v1520_v36 }
 0xec6   :  { %v2798_v2 = vpop.eup %2797  ;;  %v1525_v49 = vmul.f32 %v2796_v25, %v1521_v18 }
 0xec7   :  { %v1403_v23 = vmul.f32 %v2798_v2, %v3362_v37 }
 0xf24   :  { %v1529_v24 = vpop.permute.xlu1 %1528 }
 0xf25   :  { %v1531_v26 = vpop.permute.xlu0 %1530  ;;  %v1534_v27 = vmul.f32 %v2794_v61, %v1529_v24 }
 0xf26   :  { %v1535_v28 = vmul.f32 %v2796_v25, %v1531_v26 }
 0xf27   :  { %1538 = vrot.lane.b32.xlu0 %v1534_v27, %s2969_s3 }
 0xf28   :  { %1540 = vrot.lane.b32.xlu1 %v1535_v28, %s2969_s3  ;;  %v1406_v29 = vpop.permute.xlu1 %1405 }
 0xf29   :  { %v1408_v33 = vmul.f32 %v2798_v2, %v1406_v29 }
 0xf2b   :  { %1410 = vrot.lane.b32.xlu0 %v1408_v33, %s2969_s3 }
 0xf99   :  { %v1539_v46 = vpop.permute.xlu0 %1538 }
 0xf9a   :  { %v3425_v35 = vadd.f32 %v1539_v46, %v1524_v20  ;;  %v1541_v38 = vpop.permute.xlu1 %1540 }
 0xf9b   :  { %v3427_v51 = vadd.f32 %v1541_v38, %v1525_v49 }
 0xf9c   :  { %2799 = vtanh.f32 %v3425_v35 }
 0xf9d   :  { %2801 = vtanh.f32 %v3427_v51  ;;  %v1411_v4 = vpop.permute.xlu0 %1410 }
 0xf9e   :  { %v3432_v6 = vadd.f32 %v1411_v4, %v1403_v23 }
 0xfa0   :  { %2803 = vtanh.f32 %v3432_v6 }
 0xfa9   :  { %v2800_v30 = vpop.eup %2799 }
 0xfaa   :  { %v2802_v31 = vpop.eup %2801  ;;  %1550 = vrot.lane.b32.xlu1 %v2800_v30, %s2968_s21 }
 0xfab   :  { %1552 = vrot.lane.b32.xlu0 %v2802_v31, %s2968_s21 }
 0xfad   :  { %v2804_v7 = vpop.eup %2803 }
 0xfae   :  { %1416 = vrot.lane.b32.xlu1 %v2804_v7, %s2968_s21 }
0x101c   :  { %v1551_v52 = vpop.permute.xlu1 %1550 }
0x101d   :  { %v1553_v53 = vpop.permute.xlu0 %1552  ;;  %v1556_v54 = vmul.f32 %v2794_v61, %v1551_v52 }
0x101e   :  { %v1557_v55 = vmul.f32 %v2796_v25, %v1553_v53 }
0x101f   :  { %v1670_v57 = vrot.slane %v1556_v54, 5 }
0x1020   :  { %v1560_v37 = vrot.slane %v1557_v55, 7  ;;  %v1417_v56 = vpop.permute.xlu1 %1416  ;;  %v1671_v58 = vrot.slane %v1557_v55, 4 }
0x1021   :  { %v3438_v62 = vmul.f32 %v2798_v2, %v1417_v56  ;;  %v1770_v56 = vrot.slane %v3425_v35, 7 }
0x1022   :  { %v1562_v42 = vsel %vm1561_vm9, %v1560_v37, %v1556_v54  ;;  %v1672_v34 = vsel %vm323_vm2, %v1671_v58, %v1670_v57  ;;  %v1771_v54 = vrot.slane %v3427_v51, 7 }
0x1023   :  { %1563 = vrot.lane.b32.xlu0 %v1562_v42, %s2969_s3  ;;  %v1567_v44 = vrot.slane %v3438_v62, 3 }
0x1025   :  { %1568 = vrot.lane.b32.xlu1 %v1567_v44, %s2968_s21 }
0x1027   :  { %1673 = vrot.lane.b32.xlu0 %v1672_v34, %s2969_s3 }
0x1095   :  { %v1564_v43 = vpop.permute.xlu0 %1563 }
0x1097   :  { %v1569_v3 = vpop.permute.xlu1 %1568 }
0x1098   :  { %v1571_v5 = vsel %vm192_vm3, %v1564_v43, %v1569_v3 }
0x1099   :  { %v1674_v45 = vpop.permute.xlu0 %1673  ;;  %v1573_v9 = vrot.slane %v1571_v5, 5 }
0x109a   :  { %2607 = vmatmul.mubr.msk.f32.vlgmr.msra.gmra.mxu0 %vm192_vm3, %v1674_v45 }
0x109b   :  { %2610 = vmatpush3.msra.mxu0 %v3447_v47  ;;  %2625 = vmatprep.mubr.msk.f32.mxu0 %vm2967_vm0, %v2966_v0 }
0x109c   :  { %2596 = vmatmul.mubr.msk.f32.vlgmr.msra.gmra.mxu1 %vm329_vm4, %v1573_v9  ;;  %2611 = vmatprep.subr.mxu0 %v2966_v0 }
0x109d   :  { %2612 = vmatpush3.msra.mxu0 %v3454_v10  ;;  %2629 = vmatpush3.msra.mxu1 %v3383_v1  ;;  %v3472_v1 = vld [vmem:[#allocation7 + $0x18] sm:$0xff] }
0x109e   :  { %2613 = vmatprep.subr.mxu0 %v2966_v0  ;;  %2630 = vmatprep.subr.mxu1 %v2966_v0 }
0x109f   :  { %2614 = vmatpush3.msra.mxu0 %v3460_v11  ;;  %2631 = vmatpush3.msra.mxu1 %v3389_v39  ;;  %v3479_v39 = vld [vmem:[#allocation7 + $0x10] sm:$0xff] }
0x10a0   :  { %2615 = vmatprep.subr.mxu0 %v2966_v0  ;;  %2632 = vmatprep.subr.mxu1 %v2966_v0 }
0x10a1   :  { %2616 = vmatpush3.msra.mxu0 %v3466_v48  ;;  %2633 = vmatpush3.msra.mxu1 %v3395_v40  ;;  %v3484_v40 = vld [vmem:[#allocation7 + $0x8] sm:$0xff] }
0x10a2   :  { %2617 = vmatprep.subr.mxu0 %v2966_v0  ;;  %2634 = vmatprep.subr.mxu1 %v2966_v0 }
0x10a3   :  { %2618 = vmatpush3.msra.mxu0 %v3472_v1  ;;  %2635 = vmatpush3.msra.mxu1 %v3401_v41  ;;  %v3488_v41 = vld [vmem:[#allocation7] sm:$0xff] }
0x10a4   :  { %2619 = vmatprep.subr.mxu0 %v2966_v0  ;;  %2636 = vmatprep.mubr.msk.f32.mxu1 %vm2967_vm0, %v2966_v0 }
0x10a5   :  { %2620 = vmatpush3.msra.mxu0 %v3479_v39  ;;  %2639 = vmatprep.subr.mxu1 %v2966_v0 }
0x10a6   :  { %2621 = vmatprep.subr.mxu0 %v2966_v0 }
0x10a7   :  { %2622 = vmatpush3.msra.mxu0 %v3484_v40 }
0x10a8   :  { %2623 = vmatprep.subr.mxu0 %v2966_v0 }
0x10a9   :  { %2624 = vmatpush3.msra.mxu0 %v3488_v41 }
0x115a   :  { %v1743_v50 = vpop.f32.mrf.mxu0 }
0x115b   :  { %v1748_v12 = vrot.slane %v1743_v50, 2  ;;  %v1749_v14 = vrot.slane %v1743_v50, 3 }
0x115c   :  { %v1642_v15 = vpop.f32.mrf.mxu1  ;;  %v2608_v19 = vpop.f32.mrf.mxu0 }
0x115d   :  { %v1753_v21 = vadd.f32 %v1749_v14, %v3071_v13  ;;  %v1752_v22 = vadd.f32 %v1748_v12, %v3074_v17  ;;  %v1643_v61 = vadd.f32 %v3496_v59, %v1642_v15 }
0x115e   :  { %v2597_v63 = vpop.f32.mrf.mxu1 }
0x115f   :  { %2805 = vtanh.f32 %v1753_v21  ;;  %v2286_v27 = vmul.f32 -1.442695, %v1753_v21  ;;  %v2285_v28 = vmul.f32 -1.442695, %v1752_v22  ;;  %v2283_v2 = vmul.f32 -1.442695, %v1643_v61 }
0x1160   :  { %2807 = vtanh.f32 %v1752_v22 }
0x1161   :  { %2809 = vtanh.f32 %v1643_v61 }
0x1162   :  { %2811 = vpow2.f32 %v2286_v27 }
0x1163   :  { %2813 = vpow2.f32 %v2285_v28 }
0x1164   :  { %2815 = vpow2.f32 %v2283_v2 }
0x116c   :  { %v2806_v24 = vpop.eup %2805 }
0x116d   :  { %1780 = vrot.lane.b32.xlu1 %v2806_v24, %s2968_s21  ;;  %v2808_v25 = vpop.eup %2807 }
0x116e   :  { %v2810_v26 = vpop.eup %2809 }
0x116f   :  { %1655 = vrot.lane.b32.xlu0 %v2810_v26, %s2968_s21  ;;  %v2812_v29 = vpop.eup %2811 }
0x1170   :  { %v2814_v33 = vpop.eup %2813  ;;  %v1761_v36 = vadd.f32 1.0, %v2812_v29 }
0x1171   :  { %1778 = vrot.lane.b32.xlu1 %v2808_v25, %s2968_s21  ;;  %v2816_v18 = vpop.eup %2815  ;;  %v1760_v20 = vadd.f32 1.0, %v2814_v33 }
0x1172   :  { %2817 = vrcp.f32 %v1761_v36  ;;  %v1649_v46 = vadd.f32 1.0, %v2816_v18 }
0x1173   :  { %2819 = vrcp.f32 %v1760_v20 }
0x1174   :  { %2821 = vrcp.f32 %v1649_v46 }
0x117f   :  { %v2818_v49 = vpop.eup %2817 }
0x1180   :  { %v2820_v4 = vpop.eup %2819  ;;  %v1775_v55 = vmul.f32 %v2818_v49, %v1771_v54 }
0x1181   :  { %v2822_v30 = vpop.eup %2821  ;;  %v1774_v42 = vmul.f32 %v2820_v4, %v1770_v56 }
0x1182   :  { %v1653_v58 = vmul.f32 %v2822_v30, %v3432_v6 }
0x11df   :  { %v1781_v38 = vpop.permute.xlu1 %1780 }
0x11e0   :  { %v1785_v23 = vmul.f32 %v2818_v49, %v1781_v38 }
0x11e1   :  { %v1656_v31 = vpop.permute.xlu0 %1655 }
0x11e2   :  { %1790 = vrot.lane.b32.xlu0 %v1785_v23, %s2969_s3  ;;  %v1658_v52 = vmul.f32 %v2822_v30, %v1656_v31 }
0x11e3   :  { %v1779_v7 = vpop.permute.xlu1 %1778 }
0x11e4   :  { %v1784_v53 = vmul.f32 %v2820_v4, %v1779_v7  ;;  %1660 = vrot.lane.b32.xlu1 %v1658_v52, %s2969_s3 }
0x11e6   :  { %1788 = vrot.lane.b32.xlu0 %v1784_v53, %s2969_s3 }
0x1254   :  { %v1791_v37 = vpop.permute.xlu0 %1790 }
0x1255   :  { %v3507_v57 = vadd.f32 %v1791_v37, %v1775_v55 }
0x1256   :  { %v1661_v44 = vpop.permute.xlu1 %1660 }
0x1257   :  { %2823 = vtanh.f32 %v3507_v57  ;;  %v3511_v43 = vadd.f32 %v1661_v44, %v1653_v58 }
0x1258   :  { %v1789_v34 = vpop.permute.xlu0 %1788 }
0x1259   :  { %v3513_v3 = vadd.f32 %v1789_v34, %v1774_v42  ;;  %2825 = vtanh.f32 %v3511_v43  ;;  %v2021_v42 = vrot.slane %v3507_v57, 7 }
0x125b   :  { %2827 = vtanh.f32 %v3513_v3  ;;  %v2020_v44 = vrot.slane %v3513_v3, 7 }
0x1264   :  { %v2824_v51 = vpop.eup %2823 }
0x1265   :  { %1802 = vrot.lane.b32.xlu1 %v2824_v51, %s2968_s21 }
0x1266   :  { %v2826_v35 = vpop.eup %2825 }
0x1267   :  { %1666 = vrot.lane.b32.xlu0 %v2826_v35, %s2968_s21 }
0x1268   :  { %v2828_v5 = vpop.eup %2827 }
0x1269   :  { %1800 = vrot.lane.b32.xlu1 %v2828_v5, %s2968_s21 }
0x12d7   :  { %v1803_v6 = vpop.permute.xlu1 %1802 }
0x12d8   :  { %v1807_v45 = vmul.f32 %v2818_v49, %v1803_v6 }
0x12d9   :  { %v1667_v9 = vpop.permute.xlu0 %1666 }
0x12da   :  { %v3520_v50 = vmul.f32 %v2822_v30, %v1667_v9  ;;  %v1810_v14 = vrot.slane %v1807_v45, 7  ;;  %v1921_v22 = vrot.slane %v1807_v45, 5 }
0x12db   :  { %v1801_v12 = vpop.permute.xlu1 %1800 }
0x12dc   :  { %v1806_v15 = vmul.f32 %v2820_v4, %v1801_v12  ;;  %v1817_v19 = vrot.slane %v3520_v50, 2 }
0x12de   :  { %v1920_v21 = vrot.slane %v1806_v15, 6  ;;  %v1812_v63 = vsel %vm1811_vm10, %v1810_v14, %v1806_v15  ;;  %1818 = vrot.lane.b32.xlu1 %v1817_v19, %s2968_s21 }
0x12df   :  { %1813 = vrot.lane.b32.xlu0 %v1812_v63, %s2969_s3 }
0x12e0   :  { %v1922_v61 = vsel %vm323_vm2, %v1921_v22, %v1920_v21 }
0x12e3   :  { %1923 = vrot.lane.b32.xlu0 %v1922_v61, %s2969_s3 }
0x1350   :  { %v1819_v24 = vpop.permute.xlu1 %1818 }
0x1351   :  { %v1814_v25 = vpop.permute.xlu0 %1813 }
0x1352   :  { %v1821_v26 = vsel %vm192_vm3, %v1814_v25, %v1819_v24 }
0x1353   :  { %v1823_v27 = vrot.slane %v1821_v26, 6 }
0x1355   :  { %v1924_v28 = vpop.permute.xlu0 %1923  ;;  %2626 = vmatmul.mubr.msk.f32.vlgmr.msra.gmra.mxu0 %vm329_vm4, %v1823_v27 }
0x1356   :  { %2637 = vmatmul.mubr.msk.f32.vlgmr.msra.gmra.mxu1 %vm192_vm3, %v1924_v28 }
0x1357   :  { %2640 = vmatpush3.msra.mxu1 %v3447_v47  ;;  %2655 = vmatprep.mubr.msk.f32.mxu1 %vm2967_vm0, %v2966_v0 }
0x1358   :  { %2641 = vmatprep.subr.mxu1 %v2966_v0 }
0x1359   :  { %2642 = vmatpush3.msra.mxu1 %v3454_v10 }
0x135a   :  { %2643 = vmatprep.subr.mxu1 %v2966_v0 }
0x135b   :  { %2644 = vmatpush3.msra.mxu1 %v3460_v11 }
0x135c   :  { %2645 = vmatprep.subr.mxu1 %v2966_v0 }
0x135d   :  { %2646 = vmatpush3.msra.mxu1 %v3466_v48 }
0x135e   :  { %2647 = vmatprep.subr.mxu1 %v2966_v0 }
0x135f   :  { %2648 = vmatpush3.msra.mxu1 %v3472_v1 }
0x1360   :  { %2649 = vmatprep.subr.mxu1 %v2966_v0 }
0x1361   :  { %2650 = vmatpush3.msra.mxu1 %v3479_v39 }
0x1362   :  { %2651 = vmatprep.subr.mxu1 %v2966_v0 }
0x1363   :  { %2652 = vmatpush3.msra.mxu1 %v3484_v40 }
0x1364   :  { %2653 = vmatprep.subr.mxu1 %v2966_v0 }
0x1365   :  { %2654 = vmatpush3.msra.mxu1 %v3488_v41 }
0x1415   :  { %v1892_v47 = vpop.f32.mrf.mxu0 }
0x1416   :  { %v1893_v10 = vadd.f32 %v3496_v59, %v1892_v47  ;;  %v1993_v11 = vpop.f32.mrf.mxu1 }
0x1417   :  { %v1998_v48 = vrot.slane %v1993_v11, 1  ;;  %v1999_v2 = vrot.slane %v1993_v11, 2  ;;  %v2627_v29 = vpop.f32.mrf.mxu0 }
0x1418   :  { %2829 = vtanh.f32 %v1893_v10  ;;  %v2638_v1 = vpop.f32.mrf.mxu1  ;;  %v2288_v36 = vmul.f32 -1.442695, %v1893_v10 }
0x1419   :  { %v2002_v33 = vadd.f32 %v1998_v48, %v3074_v17  ;;  %v2003_v39 = vadd.f32 %v1999_v2, %v3071_v13 }
0x141b   :  { %2831 = vtanh.f32 %v2002_v33  ;;  %v2290_v18 = vmul.f32 -1.442695, %v2002_v33  ;;  %v2291_v20 = vmul.f32 -1.442695, %v2003_v39 }
0x141c   :  { %2833 = vtanh.f32 %v2003_v39 }
0x141d   :  { %2835 = vpow2.f32 %v2288_v36 }
0x141e   :  { %2837 = vpow2.f32 %v2290_v18 }
0x141f   :  { %2839 = vpow2.f32 %v2291_v20 }
0x1425   :  { %v2830_v40 = vpop.eup %2829 }
0x1426   :  { %1905 = vrot.lane.b32.xlu1 %v2830_v40, %s2968_s21 }
0x1428   :  { %v2832_v0 = vpop.eup %2831 }
0x1429   :  { %v2834_v41 = vpop.eup %2833 }
0x142a   :  { %2030 = vrot.lane.b32.xlu0 %v2834_v41, %s2968_s21  ;;  %2028 = vrot.lane.b32.xlu1 %v2832_v0, %s2968_s21  ;;  %v2836_v17 = vpop.eup %2835 }
0x142b   :  { %v2838_v46 = vpop.eup %2837  ;;  %v1899_v13 = vadd.f32 1.0, %v2836_v17 }
0x142c   :  { %v2840_v49 = vpop.eup %2839  ;;  %v2010_v38 = vadd.f32 1.0, %v2838_v46 }
0x142d   :  { %2841 = vrcp.f32 %v1899_v13  ;;  %v2011_v23 = vadd.f32 1.0, %v2840_v49 }
0x142e   :  { %2843 = vrcp.f32 %v2010_v38 }
0x142f   :  { %2845 = vrcp.f32 %v2011_v23 }
0x143a   :  { %v2842_v4 = vpop.eup %2841 }
0x143b   :  { %v2844_v7 = vpop.eup %2843  ;;  %v1903_v56 = vmul.f32 %v2842_v4, %v3511_v43 }
0x143c   :  { %v2846_v52 = vpop.eup %2845  ;;  %v2024_v35 = vmul.f32 %v2844_v7, %v2020_v44 }
0x143d   :  { %v2025_v51 = vmul.f32 %v2846_v52, %v2021_v42 }
0x1498   :  { %v1906_v30 = vpop.permute.xlu1 %1905 }
0x1499   :  { %v1908_v31 = vmul.f32 %v2842_v4, %v1906_v30 }
0x149b   :  { %1910 = vrot.lane.b32.xlu0 %v1908_v31, %s2969_s3 }
0x149c   :  { %v2031_v53 = vpop.permute.xlu0 %2030  ;;  %v2029_v54 = vpop.permute.xlu1 %2028 }
0x149d   :  { %v2035_v55 = vmul.f32 %v2846_v52, %v2031_v53  ;;  %v2034_v37 = vmul.f32 %v2844_v7, %v2029_v54 }
0x149f   :  { %2040 = vrot.lane.b32.xlu1 %v2035_v55, %s2969_s3  ;;  %2038 = vrot.lane.b32.xlu0 %v2034_v37, %s2969_s3 }
0x150d   :  { %v1911_v58 = vpop.permute.xlu0 %1910 }
0x150e   :  { %v1913_v34 = vadd.f32 %v1911_v58, %v1903_v56 }
0x1510   :  { %2847 = vtanh.f32 %v1913_v34 }
0x1511   :  { %v2041_v5 = vpop.permute.xlu1 %2040  ;;  %v2039_v6 = vpop.permute.xlu0 %2038 }
0x1512   :  { %v3559_v45 = vadd.f32 %v2041_v5, %v2025_v51  ;;  %v2044_v9 = vadd.f32 %v2039_v6, %v2024_v35 }
0x1514   :  { %2849 = vtanh.f32 %v3559_v45  ;;  %v2220_v23 = vrot.slane %v3559_v45, 7 }
0x1515   :  { %2851 = vtanh.f32 %v2044_v9 }
0x151d   :  { %v2848_v12 = vpop.eup %2847 }
0x151e   :  { %1916 = vrot.lane.b32.xlu1 %v2848_v12, %s2968_s21 }
0x1521   :  { %v2850_v43 = vpop.eup %2849 }
0x1522   :  { %v2852_v14 = vpop.eup %2851  ;;  %2052 = vrot.lane.b32.xlu0 %v2850_v43, %s2968_s21 }
0x1523   :  { %2050 = vrot.lane.b32.xlu1 %v2852_v14, %s2968_s21 }
0x1590   :  { %v1917_v57 = vpop.permute.xlu1 %1916 }
0x1591   :  { %v1919_v21 = vmul.f32 %v2842_v4, %v1917_v57 }
0x1593   :  { %v2068_v61 = vrot.slane %v1919_v21, 1 }
0x1594   :  { %v2053_v3 = vpop.permute.xlu0 %2052 }
0x1595   :  { %v2057_v15 = vmul.f32 %v2846_v52, %v2053_v3  ;;  %v2051_v19 = vpop.permute.xlu1 %2050 }
0x1596   :  { %v2056_v63 = vmul.f32 %v2844_v7, %v2051_v19 }
0x1597   :  { %v2060_v22 = vrot.slane %v2057_v15, 7 }
0x1598   :  { %2061 = vrot.lane.b32.xlu0 %v2056_v63, %s2969_s3 }
0x1599   :  { %2063 = vrot.lane.b32.xlu1 %v2060_v22, %s2969_s3 }
0x159c   :  { %2069 = vrot.lane.b32.xlu0 %v2068_v61, %s2968_s21 }
0x160a   :  { %v3568_v24 = vpop.permute.xlu0 %2061 }
0x160b   :  { %v3570_v25 = vpop.permute.xlu1 %2063 }
0x160e   :  { %v2070_v26 = vpop.permute.xlu0 %2069 }
0x160f   :  { %v2072_v27 = vsel %vm192_vm3, %v3568_v24, %v2070_v26  ;;  %v2073_v28 = vsel %vm192_vm3, %v3570_v25, %v2070_v26 }
0x1610   :  { %v2077_v47 = vrot.slane %v2072_v27, 7  ;;  %v2078_v10 = vrot.slane %v2073_v28, 7 }
0x1612   :  { %v2079_v11 = vsel %vm2076_vm11, %v2077_v47, %v2078_v10 }
0x1613   :  { %2656 = vmatmul.mubr.msk.f32.vlgmr.msra.gmra.mxu1 %vm329_vm4, %v2079_v11 }
0x16d3   :  { %v2148_v48 = vpop.f32.mrf.mxu1 }
0x16d4   :  { %v2149_v2 = vadd.f32 %v3496_v59, %v2148_v48 }
0x16d5   :  { %v2657_v29 = vpop.f32.mrf.mxu1 }
0x16d6   :  { %2853 = vtanh.f32 %v2149_v2  ;;  %v2293_v33 = vmul.f32 -1.442695, %v2149_v2 }
0x16d8   :  { %2855 = vpow2.f32 %v2293_v33 }
0x16e3   :  { %v2854_v1 = vpop.eup %2853 }
0x16e4   :  { %2161 = vrot.lane.b32.xlu1 %v2854_v1, %s2968_s21 }
0x16e5   :  { %v2856_v39 = vpop.eup %2855 }
0x16e6   :  { %v2155_v40 = vadd.f32 1.0, %v2856_v39 }
0x16e8   :  { %2857 = vrcp.f32 %v2155_v40 }
0x16f5   :  { %v2858_v0 = vpop.eup %2857 }
0x16f6   :  { %v2159_v59 = vmul.f32 %v2858_v0, %v1913_v34 }
0x1756   :  { %v2162_v41 = vpop.permute.xlu1 %2161 }
0x1757   :  { %v2164_v36 = vmul.f32 %v2858_v0, %v2162_v41 }
0x1759   :  { %2166 = vrot.lane.b32.xlu0 %v2164_v36, %s2969_s3 }
0x175d   :  { %2176 = vrot.lane.b32.xlu0 %v3183_v60, %s2969_s3 }
0x1761   :  { %2185 = vrot.lane.b32.xlu0 %v3438_v62, %s2969_s3 }
0x1765   :  { %2182 = vrot.lane.b32.xlu0 %v3306_v32, %s2970_s5 }
0x17cb   :  { %v2167_v18 = vpop.permute.xlu0 %2166 }
0x17cc   :  { %v2169_v20 = vadd.f32 %v2167_v18, %v2159_v59 }
0x17ce   :  { %2859 = vtanh.f32 %v2169_v20  ;;  %v2228_v60 = vrot.slane %v2169_v20, 1 }
0x17cf   :  { %v2177_v32 = vpop.permute.xlu0 %2176 }
0x17d3   :  { %v2186_v49 = vpop.permute.xlu0 %2185 }
0x17db   :  { %v2860_v17 = vpop.eup %2859 }
0x17dc   :  { %2172 = vrot.lane.b32.xlu1 %v2860_v17, %s2968_s21 }
0x17e0   :  { %2179 = vrot.lane.b32.xlu1 %v3244_v16, %s2968_s21 }
0x17e4   :  { %2188 = vrot.lane.b32.xlu1 %v3520_v50, %s2968_s21  ;;  %v2183_v50 = vpop.permute.xlu0 %2182 }
0x17e8   :  { %2191 = vrot.lane.b32.xlu1 %v1919_v21, %s2970_s5 }
0x17ec   :  { %2221 = vrot.lane.b32.xlu1 %v2044_v9, %s2969_s3 }
0x17f0   :  { %2229 = vrot.lane.b32.xlu1 %v2228_v60, %s2968_s21 }
0x184e   :  { %v2173_v62 = vpop.permute.xlu1 %2172 }
0x184f   :  { %v2175_v46 = vmul.f32 %v2858_v0, %v2173_v62 }
0x1851   :  { %v2214_v13 = vrot.slane %v2175_v46, 1 }
0x1852   :  { %v2180_v38 = vpop.permute.xlu1 %2179 }
0x1853   :  { %2215 = vrot.lane.b32.xlu0 %v2214_v13, %s2968_s21  ;;  %v2194_v16 = vsel %vm192_vm3, %v2177_v32, %v2180_v38 }
0x1854   :  { %v2195_v30 = vsel %vm329_vm4, %v2194_v16, %v2183_v50 }
0x1855   :  { %v2197_v53 = vsel %vm2196_vm12, %v2195_v30, %v3368_v8 }
0x1856   :  { %v2189_v4 = vpop.permute.xlu1 %2188 }
0x1857   :  { %2223 = vrot.lane.b32.xlu0 %v2220_v23, %s2969_s3  ;;  %v2198_v31 = vsel %vm192_vm3, %v2186_v49, %v2189_v4 }
0x185a   :  { %v2192_v7 = vpop.permute.xlu1 %2191 }
0x185b   :  { %v2199_v52 = vsel %vm329_vm4, %v2198_v31, %v2192_v7 }
0x185c   :  { %v2200_v54 = vsel %vm2196_vm12, %v2199_v52, %v2175_v46 }
0x185d   :  { %v2203_v55 = vcombine.low %v2197_v53, %v2200_v54 }
0x185e   :  { %v2222_v37 = vpop.permute.xlu1 %2221 }
0x185f   :  { %2294 = vst.sshfl [vmem:[%s3625_s6] sm:$0x33 pattern:$0x76325410] %v2203_v55 }
0x1862   :  { %v2230_v42 = vpop.permute.xlu1 %2229 }
0x18c5   :  { %v2216_v56 = vpop.permute.xlu0 %2215 }
0x18c6   :  { %v2232_v58 = vsel %vm192_vm3, %v3568_v24, %v2216_v56  ;;  %v2233_v8 = vsel %vm192_vm3, %v3570_v25, %v2216_v56 }
0x18c7   :  { %v2234_v44 = vsel %vm329_vm4, %v2232_v58, %v2222_v37 }
0x18c8   :  { %v2236_v34 = vsel %vm2196_vm12, %v2234_v44, %v2230_v42 }
0x18c9   :  { %2238 = vst [vmem:[%s3626_s7 - $0x7] sm:$0x80] %v2236_v34  ;;  %v2224_v51 = vpop.permute.xlu0 %2223 }
0x18ca   :  { %v2235_v35 = vsel %vm329_vm4, %v2233_v8, %v2224_v51 }
0x18cb   :  { %v2237_v5 = vsel %vm2196_vm12, %v2235_v35, %v2230_v42 }
0x18cc   :  { %2239 = vst [vmem:[%s3626_s7 + $0x1] sm:$0x1] %v2237_v5 }
0x18cd   :  { %2248 = vsyncpa [#allocation3], 1 }
0x18ce   :  { %2249 = vsyncpa [#allocation5], 1 }
0x18cf   :  { %2250 = vsyncpa [#allocation8], 1 }

</bundles_post_ra>
